<compile_context>
chip_gen: v7x
topology: tpu7x:2x2x1
jax: 0.10.0
libtpu: 0.0.40
codegen_flags: <defaults>
</compile_context>

<pallas_src>
import jax
import jax.numpy as jnp
from jax.experimental import pallas as pl
from jax.experimental.pallas import tpu as pltpu


MAX_B_TILE = 128  # lane-padded intermediates stay well inside VMEM on v5e/v6e/v7x


def _round_up(a, m):
    return ((a + m - 1) // m) * m


# ---------------------------------------------------------------------------
# Pallas kernel: whole CNN_LITE forward for a tile of batch rows per grid step.
# ---------------------------------------------------------------------------
def cnn_lite_kernel(x_ref,
                    w1_ref, b1_ref, w2_ref, b2_ref,
                    w3_ref, b3_ref, w4_ref, b4_ref,
                    fw1_ref, fb1_ref, fw2_ref, fb2_ref, fw3_ref, fb3_ref,
                    out_ref):
    BT, L, _ = x_ref.shape
    L2 = L // 2

    def shift_dn(a, k):
        # y[:, l, :] = a[:, l-k, :], zero-padded for l < k   (per batch row)
        z = jnp.zeros((BT, k, a.shape[2]), jnp.float32)
        return jnp.concatenate([z, a[:, :a.shape[1] - k, :]], axis=1)

    def shift_up(a, k):
        # y[:, l, :] = a[:, l+k, :], zero-padded for l >= L-k (per batch row)
        z = jnp.zeros((BT, k, a.shape[2]), jnp.float32)
        return jnp.concatenate([a[:, k:, :], z], axis=1)

    def conv3_same_relu(a, wk_ref, b_ref, dil):
        # 'same' Conv1d(kernel=3) with tap spacing `dil`; all three taps folded
        # into a single MXU matmul: (BT*L, 3*C) @ (3*C, Cout) + bias, ReLU.
        Lx, C = a.shape[1], a.shape[2]
        xk = jnp.concatenate([shift_dn(a, dil), a, shift_up(a, dil)], axis=-1)
        xk2 = xk.reshape(BT * Lx, 3 * C)
        y = (jnp.dot(xk2, wk_ref[...], preferred_element_type=jnp.float32)
             + b_ref[...])
        return jnp.maximum(y, 0.0).reshape(BT, Lx, wk_ref.shape[1])

    x = x_ref[...].astype(jnp.float32)                     # (BT, L, 2)

    h1 = conv3_same_relu(x, w1_ref, b1_ref, 1)             # (BT, L, 4)
    h2 = conv3_same_relu(h1, w2_ref, b2_ref, 1)            # (BT, L, 8)

    # MaxPool1d(kernel=2, stride=2), kept "dilated": pooled value j lives at
    # row l = 2j; odd rows carry don't-care data that is never read back.
    p = jnp.maximum(h2, shift_up(h2, 1))                   # (BT, L, 8)

    # conv3/conv4 act on the dilated sequence, so their neighbour taps are +-2.
    h3 = conv3_same_relu(p, w3_ref, b3_ref, 2)              # (BT, L, 16), valid @ even l
    h4 = conv3_same_relu(h3, w4_ref, b4_ref, 2)             # (BT, L, 32), valid @ even l

    # AdaptiveAvgPool1d(1): mean over the L2 valid (even-l) positions.
    row = jax.lax.broadcasted_iota(jnp.int32, (1, L, 1), 1)
    keep = (jnp.bitwise_and(row, 1) == 0).astype(jnp.float32)   # (1, L, 1)
    g = jnp.sum(h4 * keep, axis=1) * (1.0 / L2)             # (BT, 32)

    # FC head.
    z1 = jnp.maximum(jnp.dot(g, fw1_ref[...], preferred_element_type=jnp.float32)
                     + fb1_ref[...], 0.0)
    z2 = jnp.maximum(jnp.dot(z1, fw2_ref[...], preferred_element_type=jnp.float32)
                     + fb2_ref[...], 0.0)
    z3 = (jnp.dot(z2, fw3_ref[...], preferred_element_type=jnp.float32)
          + fb3_ref[...])                                   # (BT, 8)

    # Lane-dense store: classes on sublanes, batch rows on the 128-lane axis.
    out_ref[...] = jnp.transpose(z3).astype(out_ref.dtype)  # (8, BT)


# ---------------------------------------------------------------------------
# Wrapper
# ---------------------------------------------------------------------------
@jax.jit
def cnn_lite_forward(x, params):
    B, L, Cin = x.shape
    assert Cin == 2 and L % 2 == 0

    (w1, b1, w2, b2, w3, b3, w4, b4, fw1, fb1, fw2, fb2, fw3, fb3) = params

    # One-time tap fold: (3, Cin, Cout) -> (3*Cin, Cout). Row blocks
    # [w[0]; w[1]; w[2]] match the in-kernel lane concat [x_prev | x | x_next].
    w1k = w1.reshape(-1, w1.shape[-1])
    w2k = w2.reshape(-1, w2.shape[-1])
    w3k = w3.reshape(-1, w3.shape[-1])
    w4k = w4.reshape(-1, w4.shape[-1])

    # Batch tiling: pad B up to a multiple of the batch tile.
    bt = min(MAX_B_TILE, _round_up(B, 8))
    Bp = _round_up(B, bt)
    if Bp != B:
        x = jnp.pad(x, ((0, Bp - B), (0, 0), (0, 0)))
    grid = (Bp // bt,)

    def full_spec(arr):
        nd = arr.ndim
        return pl.BlockSpec(arr.shape, lambda b, _n=nd: (0,) * _n)

    in_specs = [
        pl.BlockSpec((bt, L, Cin), lambda b: (b, 0, 0)),
        full_spec(w1k), full_spec(b1),
        full_spec(w2k), full_spec(b2),
        full_spec(w3k), full_spec(b3),
        full_spec(w4k), full_spec(b4),
        full_spec(fw1), full_spec(fb1),
        full_spec(fw2), full_spec(fb2),
        full_spec(fw3), full_spec(fb3),
    ]
    # Output stored transposed (classes x batch) so the batch tile sits on lanes.
    out_spec = pl.BlockSpec((8, bt), lambda b: (0, b))

    out_t = pl.pallas_call(
        cnn_lite_kernel,
        out_shape=jax.ShapeDtypeStruct((8, Bp), jnp.float32),
        grid=grid,
        in_specs=in_specs,
        out_specs=out_spec,
        compiler_params=pltpu.CompilerParams(
            dimension_semantics=("parallel",),
            vmem_limit_bytes=48 * 1024 * 1024),
    )(x, w1k, b1, w2k, b2, w3k, b3, w4k, b4, fw1, fb1, fw2, fb2, fw3, fb3)

    return jnp.transpose(out_t)[:B]        # (B, 8)


# ---------------------------------------------------------------------------
# Pure-JAX reference (same math) for correctness checking.
# ---------------------------------------------------------------------------
def conv1d_same_ref(x, w, b):        # x: (B, L, Cin); w: (3, Cin, Cout); b: (1, Cout)
    B, L, Cin = x.shape
    xp = jnp.pad(x, ((0, 0), (1, 1), (0, 0)))
    y = b[None, :, :]
    for t in range(3):
        y = y + jnp.einsum('blc,cd->bld', xp[:, t:t + L, :], w[t])
    return y


def cnn_lite_ref(x, params):
    (w1, b1, w2, b2, w3, b3, w4, b4, fw1, fb1, fw2, fb2, fw3, fb3) = params
    h = jax.nn.relu(conv1d_same_ref(x, w1, b1))
    h = jax.nn.relu(conv1d_same_ref(h, w2, b2))
    B, L, C = h.shape
    h = jnp.max(h.reshape(B, L // 2, 2, C), axis=2)            # MaxPool1d(2, 2)
    h = jax.nn.relu(conv1d_same_ref(h, w3, b3))
    h = jax.nn.relu(conv1d_same_ref(h, w4, b4))
    g = jnp.mean(h, axis=1)                                     # global avg pool -> (B, 32)
    z = jax.nn.relu(g @ fw1 + fb1)
    z = jax.nn.relu(z @ fw2 + fb2)
    z = z @ fw3 + fb3
    return z


# ---------------------------------------------------------------------------
# Deterministic parameter construction (shapes from CNN_LITE.__init__).
# ---------------------------------------------------------------------------
def make_params(key):
    def nrm(k, shape, scale=0.1):
        return scale * jax.random.normal(k, shape, dtype=jnp.float32)

    ks = jax.random.split(key, 14)
    w1 = nrm(ks[0], (3, 2, 4));    b1 = nrm(ks[1], (1, 4))
    w2 = nrm(ks[2], (3, 4, 8));    b2 = nrm(ks[3], (1, 8))
    w3 = nrm(ks[4], (3, 8, 16));   b3 = nrm(ks[5], (1, 16))
    w4 = nrm(ks[6], (3, 16, 32));  b4 = nrm(ks[7], (1, 32))
    fw1 = nrm(ks[8], (32, 16));    fb1 = nrm(ks[9], (1, 16))
    fw2 = nrm(ks[10], (16, 16));   fb2 = nrm(ks[11], (1, 16))
    fw3 = nrm(ks[12], (16, 8));    fb3 = nrm(ks[13], (1, 8))
    return (w1, b1, w2, b2, w3, b3, w4, b4, fw1, fb1, fw2, fb2, fw3, fb3)


if __name__ == "__main__":
    key = jax.random.PRNGKey(0)
    kx, kp, kx2 = jax.random.split(key, 3)
    params = make_params(kp)

    # Small case: (batch, seq, 2) as seen by forward() before its internal permute.
    B, L = 2, 16
    x = jax.random.normal(kx, (B, L, 2), dtype=jnp.float32)
    out = jax.block_until_ready(cnn_lite_forward(x, params))
    ref = cnn_lite_ref(x, params)
    assert out.shape == (B, 8)
    assert jnp.allclose(out, ref, atol=1e-4, rtol=1e-4), (out, ref)

    # Larger batch: exercises batch padding and a multi-step "parallel" grid.
    B2 = 200
    x2 = jax.random.normal(kx2, (B2, L, 2), dtype=jnp.float32)
    out2 = jax.block_until_ready(cnn_lite_forward(x2, params))
    ref2 = cnn_lite_ref(x2, params)
    assert out2.shape == (B2, 8)
    assert jnp.allclose(out2, ref2, atol=1e-4, rtol=1e-4)

    print("KERNEL_OK")
</pallas_src>

<mosaic_0001>
module attributes {stable_mosaic.version = 11 : i64} {
  func.func @cnn_lite_kernel(%arg0: i32, %arg1: memref<8x16x2xf32, #tpu.memory_space<vmem>>, %arg2: memref<6x4xf32, #tpu.memory_space<vmem>>, %arg3: memref<1x4xf32, #tpu.memory_space<vmem>>, %arg4: memref<12x8xf32, #tpu.memory_space<vmem>>, %arg5: memref<1x8xf32, #tpu.memory_space<vmem>>, %arg6: memref<24x16xf32, #tpu.memory_space<vmem>>, %arg7: memref<1x16xf32, #tpu.memory_space<vmem>>, %arg8: memref<48x32xf32, #tpu.memory_space<vmem>>, %arg9: memref<1x32xf32, #tpu.memory_space<vmem>>, %arg10: memref<32x16xf32, #tpu.memory_space<vmem>>, %arg11: memref<1x16xf32, #tpu.memory_space<vmem>>, %arg12: memref<16x16xf32, #tpu.memory_space<vmem>>, %arg13: memref<1x16xf32, #tpu.memory_space<vmem>>, %arg14: memref<16x8xf32, #tpu.memory_space<vmem>>, %arg15: memref<1x8xf32, #tpu.memory_space<vmem>>, %arg16: memref<8x8xf32, #tpu.memory_space<vmem>>) attributes {dimension_semantics = [#tpu.dimension_semantics<parallel>], iteration_bounds = array<i64: 1>, scalar_prefetch = 0 : i64, scratch_operands = 0 : i64, tpu.core_type = #tpu.core_type<tc>, window_params = [{transform_indices = @transform_0, window_bounds = array<i64: 8, 16, 2>}, {pipeline_mode = #tpu.pipeline_mode<synchronous>, transform_indices = @transform_1, window_bounds = array<i64: 6, 4>}, {pipeline_mode = #tpu.pipeline_mode<synchronous>, transform_indices = @transform_2, window_bounds = array<i64: 1, 4>}, {pipeline_mode = #tpu.pipeline_mode<synchronous>, transform_indices = @transform_3, window_bounds = array<i64: 12, 8>}, {pipeline_mode = #tpu.pipeline_mode<synchronous>, transform_indices = @transform_4, window_bounds = array<i64: 1, 8>}, {pipeline_mode = #tpu.pipeline_mode<synchronous>, transform_indices = @transform_5, window_bounds = array<i64: 24, 16>}, {pipeline_mode = #tpu.pipeline_mode<synchronous>, transform_indices = @transform_6, window_bounds = array<i64: 1, 16>}, {pipeline_mode = #tpu.pipeline_mode<synchronous>, transform_indices = @transform_7, window_bounds = array<i64: 48, 32>}, {pipeline_mode = #tpu.pipeline_mode<synchronous>, transform_indices = @transform_8, window_bounds = array<i64: 1, 32>}, {pipeline_mode = #tpu.pipeline_mode<synchronous>, transform_indices = @transform_9, window_bounds = array<i64: 32, 16>}, {pipeline_mode = #tpu.pipeline_mode<synchronous>, transform_indices = @transform_10, window_bounds = array<i64: 1, 16>}, {pipeline_mode = #tpu.pipeline_mode<synchronous>, transform_indices = @transform_11, window_bounds = array<i64: 16, 16>}, {pipeline_mode = #tpu.pipeline_mode<synchronous>, transform_indices = @transform_12, window_bounds = array<i64: 1, 16>}, {pipeline_mode = #tpu.pipeline_mode<synchronous>, transform_indices = @transform_13, window_bounds = array<i64: 16, 8>}, {pipeline_mode = #tpu.pipeline_mode<synchronous>, transform_indices = @transform_14, window_bounds = array<i64: 1, 8>}, {transform_indices = @transform_15, window_bounds = array<i64: 8, 8>}]} {
    %c0 = arith.constant 0 : index
    %c0_0 = arith.constant 0 : index
    %c0_1 = arith.constant 0 : index
    %0 = vector.load %arg1[%c0, %c0_0, %c0_1] : memref<8x16x2xf32, #tpu.memory_space<vmem>>, vector<8x16x2xf32>
    %cst = arith.constant 0.000000e+00 : f32
    %1 = vector.broadcast %cst : f32 to vector<8x1x2xf32>
    %2 = vector.extract_strided_slice %0 {offsets = [0, 0, 0], sizes = [8, 15, 2], strides = [1, 1, 1]} : vector<8x16x2xf32> to vector<8x15x2xf32>
    %3 = tpu.concatenate %1, %2 in 1 : vector<8x1x2xf32>, vector<8x15x2xf32> -> vector<8x16x2xf32>
    %cst_2 = arith.constant 0.000000e+00 : f32
    %4 = vector.broadcast %cst_2 : f32 to vector<8x1x2xf32>
    %5 = vector.extract_strided_slice %0 {offsets = [0, 1, 0], sizes = [8, 15, 2], strides = [1, 1, 1]} : vector<8x16x2xf32> to vector<8x15x2xf32>
    %6 = tpu.concatenate %5, %4 in 1 : vector<8x15x2xf32>, vector<8x1x2xf32> -> vector<8x16x2xf32>
    %7 = tpu.concatenate %3, %0, %6 in 2 : vector<8x16x2xf32>, vector<8x16x2xf32>, vector<8x16x2xf32> -> vector<8x16x6xf32>
    %8 = vector.shape_cast %7 : vector<8x16x6xf32> to vector<128x6xf32>
    %c0_3 = arith.constant 0 : index
    %c0_4 = arith.constant 0 : index
    %9 = vector.load %arg2[%c0_3, %c0_4] : memref<6x4xf32, #tpu.memory_space<vmem>>, vector<6x4xf32>
    %cst_5 = arith.constant dense<0.000000e+00> : vector<128x4xf32>
    %10 = tpu.matmul %8, %9, %cst_5 {dimension_numbers = #tpu.dot_dimension_numbers<[1], [0], [0], [1], [0, 0, 1, 1], [], []>} : vector<128x6xf32>, vector<6x4xf32>, vector<128x4xf32> -> vector<128x4xf32>
    %c0_6 = arith.constant 0 : index
    %c0_7 = arith.constant 0 : index
    %11 = vector.load %arg3[%c0_6, %c0_7] : memref<1x4xf32, #tpu.memory_space<vmem>>, vector<1x4xf32>
    %12 = vector.broadcast %11 : vector<1x4xf32> to vector<128x4xf32>
    %13 = arith.addf %10, %12 : vector<128x4xf32>
    %cst_8 = arith.constant 0.000000e+00 : f32
    %14 = vector.broadcast %cst_8 : f32 to vector<128x4xf32>
    %15 = arith.maximumf %13, %14 : vector<128x4xf32>
    %16 = vector.shape_cast %15 : vector<128x4xf32> to vector<8x16x4xf32>
    %cst_9 = arith.constant 0.000000e+00 : f32
    %17 = vector.broadcast %cst_9 : f32 to vector<8x1x4xf32>
    %18 = vector.extract_strided_slice %16 {offsets = [0, 0, 0], sizes = [8, 15, 4], strides = [1, 1, 1]} : vector<8x16x4xf32> to vector<8x15x4xf32>
    %19 = tpu.concatenate %17, %18 in 1 : vector<8x1x4xf32>, vector<8x15x4xf32> -> vector<8x16x4xf32>
    %cst_10 = arith.constant 0.000000e+00 : f32
    %20 = vector.broadcast %cst_10 : f32 to vector<8x1x4xf32>
    %21 = vector.extract_strided_slice %16 {offsets = [0, 1, 0], sizes = [8, 15, 4], strides = [1, 1, 1]} : vector<8x16x4xf32> to vector<8x15x4xf32>
    %22 = tpu.concatenate %21, %20 in 1 : vector<8x15x4xf32>, vector<8x1x4xf32> -> vector<8x16x4xf32>
    %23 = tpu.concatenate %19, %16, %22 in 2 : vector<8x16x4xf32>, vector<8x16x4xf32>, vector<8x16x4xf32> -> vector<8x16x12xf32>
    %24 = vector.shape_cast %23 : vector<8x16x12xf32> to vector<128x12xf32>
    %c0_11 = arith.constant 0 : index
    %c0_12 = arith.constant 0 : index
    %25 = vector.load %arg4[%c0_11, %c0_12] : memref<12x8xf32, #tpu.memory_space<vmem>>, vector<12x8xf32>
    %cst_13 = arith.constant dense<0.000000e+00> : vector<128x8xf32>
    %26 = tpu.matmul %24, %25, %cst_13 {dimension_numbers = #tpu.dot_dimension_numbers<[1], [0], [0], [1], [0, 0, 1, 1], [], []>} : vector<128x12xf32>, vector<12x8xf32>, vector<128x8xf32> -> vector<128x8xf32>
    %c0_14 = arith.constant 0 : index
    %c0_15 = arith.constant 0 : index
    %27 = vector.load %arg5[%c0_14, %c0_15] : memref<1x8xf32, #tpu.memory_space<vmem>>, vector<1x8xf32>
    %28 = vector.broadcast %27 : vector<1x8xf32> to vector<128x8xf32>
    %29 = arith.addf %26, %28 : vector<128x8xf32>
    %cst_16 = arith.constant 0.000000e+00 : f32
    %30 = vector.broadcast %cst_16 : f32 to vector<128x8xf32>
    %31 = arith.maximumf %29, %30 : vector<128x8xf32>
    %32 = vector.shape_cast %31 : vector<128x8xf32> to vector<8x16x8xf32>
    %cst_17 = arith.constant 0.000000e+00 : f32
    %33 = vector.broadcast %cst_17 : f32 to vector<8x1x8xf32>
    %34 = vector.extract_strided_slice %32 {offsets = [0, 1, 0], sizes = [8, 15, 8], strides = [1, 1, 1]} : vector<8x16x8xf32> to vector<8x15x8xf32>
    %35 = tpu.concatenate %34, %33 in 1 : vector<8x15x8xf32>, vector<8x1x8xf32> -> vector<8x16x8xf32>
    %36 = arith.maximumf %32, %35 : vector<8x16x8xf32>
    %cst_18 = arith.constant 0.000000e+00 : f32
    %37 = vector.broadcast %cst_18 : f32 to vector<8x2x8xf32>
    %38 = vector.extract_strided_slice %36 {offsets = [0, 0, 0], sizes = [8, 14, 8], strides = [1, 1, 1]} : vector<8x16x8xf32> to vector<8x14x8xf32>
    %39 = tpu.concatenate %37, %38 in 1 : vector<8x2x8xf32>, vector<8x14x8xf32> -> vector<8x16x8xf32>
    %cst_19 = arith.constant 0.000000e+00 : f32
    %40 = vector.broadcast %cst_19 : f32 to vector<8x2x8xf32>
    %41 = vector.extract_strided_slice %36 {offsets = [0, 2, 0], sizes = [8, 14, 8], strides = [1, 1, 1]} : vector<8x16x8xf32> to vector<8x14x8xf32>
    %42 = tpu.concatenate %41, %40 in 1 : vector<8x14x8xf32>, vector<8x2x8xf32> -> vector<8x16x8xf32>
    %43 = tpu.concatenate %39, %36, %42 in 2 : vector<8x16x8xf32>, vector<8x16x8xf32>, vector<8x16x8xf32> -> vector<8x16x24xf32>
    %44 = vector.shape_cast %43 : vector<8x16x24xf32> to vector<128x24xf32>
    %c0_20 = arith.constant 0 : index
    %c0_21 = arith.constant 0 : index
    %45 = vector.load %arg6[%c0_20, %c0_21] : memref<24x16xf32, #tpu.memory_space<vmem>>, vector<24x16xf32>
    %cst_22 = arith.constant dense<0.000000e+00> : vector<128x16xf32>
    %46 = tpu.matmul %44, %45, %cst_22 {dimension_numbers = #tpu.dot_dimension_numbers<[1], [0], [0], [1], [0, 0, 1, 1], [], []>} : vector<128x24xf32>, vector<24x16xf32>, vector<128x16xf32> -> vector<128x16xf32>
    %c0_23 = arith.constant 0 : index
    %c0_24 = arith.constant 0 : index
    %47 = vector.load %arg7[%c0_23, %c0_24] : memref<1x16xf32, #tpu.memory_space<vmem>>, vector<1x16xf32>
    %48 = vector.broadcast %47 : vector<1x16xf32> to vector<128x16xf32>
    %49 = arith.addf %46, %48 : vector<128x16xf32>
    %cst_25 = arith.constant 0.000000e+00 : f32
    %50 = vector.broadcast %cst_25 : f32 to vector<128x16xf32>
    %51 = arith.maximumf %49, %50 : vector<128x16xf32>
    %52 = vector.shape_cast %51 : vector<128x16xf32> to vector<8x16x16xf32>
    %cst_26 = arith.constant 0.000000e+00 : f32
    %53 = vector.broadcast %cst_26 : f32 to vector<8x2x16xf32>
    %54 = vector.extract_strided_slice %52 {offsets = [0, 0, 0], sizes = [8, 14, 16], strides = [1, 1, 1]} : vector<8x16x16xf32> to vector<8x14x16xf32>
    %55 = tpu.concatenate %53, %54 in 1 : vector<8x2x16xf32>, vector<8x14x16xf32> -> vector<8x16x16xf32>
    %cst_27 = arith.constant 0.000000e+00 : f32
    %56 = vector.broadcast %cst_27 : f32 to vector<8x2x16xf32>
    %57 = vector.extract_strided_slice %52 {offsets = [0, 2, 0], sizes = [8, 14, 16], strides = [1, 1, 1]} : vector<8x16x16xf32> to vector<8x14x16xf32>
    %58 = tpu.concatenate %57, %56 in 1 : vector<8x14x16xf32>, vector<8x2x16xf32> -> vector<8x16x16xf32>
    %59 = tpu.concatenate %55, %52, %58 in 2 : vector<8x16x16xf32>, vector<8x16x16xf32>, vector<8x16x16xf32> -> vector<8x16x48xf32>
    %60 = vector.shape_cast %59 : vector<8x16x48xf32> to vector<128x48xf32>
    %c0_28 = arith.constant 0 : index
    %c0_29 = arith.constant 0 : index
    %61 = vector.load %arg8[%c0_28, %c0_29] : memref<48x32xf32, #tpu.memory_space<vmem>>, vector<48x32xf32>
    %cst_30 = arith.constant dense<0.000000e+00> : vector<128x32xf32>
    %62 = tpu.matmul %60, %61, %cst_30 {dimension_numbers = #tpu.dot_dimension_numbers<[1], [0], [0], [1], [0, 0, 1, 1], [], []>} : vector<128x48xf32>, vector<48x32xf32>, vector<128x32xf32> -> vector<128x32xf32>
    %c0_31 = arith.constant 0 : index
    %c0_32 = arith.constant 0 : index
    %63 = vector.load %arg9[%c0_31, %c0_32] : memref<1x32xf32, #tpu.memory_space<vmem>>, vector<1x32xf32>
    %64 = vector.broadcast %63 : vector<1x32xf32> to vector<128x32xf32>
    %65 = arith.addf %62, %64 : vector<128x32xf32>
    %cst_33 = arith.constant 0.000000e+00 : f32
    %66 = vector.broadcast %cst_33 : f32 to vector<128x32xf32>
    %67 = arith.maximumf %65, %66 : vector<128x32xf32>
    %68 = vector.shape_cast %67 : vector<128x32xf32> to vector<8x16x32xf32>
    %69 = tpu.iota {dimensions = array<i32: 1>} : vector<1x16x1xi32>
    %c1_i32 = arith.constant 1 : i32
    %70 = vector.broadcast %c1_i32 : i32 to vector<1x16x1xi32>
    %71 = arith.andi %69, %70 : vector<1x16x1xi32>
    %c0_i32 = arith.constant 0 : i32
    %72 = vector.broadcast %c0_i32 : i32 to vector<1x16x1xi32>
    %73 = arith.cmpi eq, %71, %72 : vector<1x16x1xi32>
    %74 = arith.extui %73 : vector<1x16x1xi1> to vector<1x16x1xi32>
    %75 = arith.sitofp %74 : vector<1x16x1xi32> to vector<1x16x1xf32>
    %76 = vector.broadcast %75 : vector<1x16x1xf32> to vector<8x16x32xf32>
    %77 = arith.mulf %68, %76 : vector<8x16x32xf32>
    %cst_34 = arith.constant dense<0.000000e+00> : vector<8x32xf32>
    %78 = vector.multi_reduction <add>, %77, %cst_34 [1] : vector<8x16x32xf32> to vector<8x32xf32>
    %cst_35 = arith.constant 1.250000e-01 : f32
    %79 = vector.broadcast %cst_35 : f32 to vector<8x32xf32>
    %80 = arith.mulf %78, %79 : vector<8x32xf32>
    %c0_36 = arith.constant 0 : index
    %c0_37 = arith.constant 0 : index
    %81 = vector.load %arg10[%c0_36, %c0_37] : memref<32x16xf32, #tpu.memory_space<vmem>>, vector<32x16xf32>
    %cst_38 = arith.constant dense<0.000000e+00> : vector<8x16xf32>
    %82 = tpu.matmul %80, %81, %cst_38 {dimension_numbers = #tpu.dot_dimension_numbers<[1], [0], [0], [1], [0, 0, 1, 1], [], []>} : vector<8x32xf32>, vector<32x16xf32>, vector<8x16xf32> -> vector<8x16xf32>
    %c0_39 = arith.constant 0 : index
    %c0_40 = arith.constant 0 : index
    %83 = vector.load %arg11[%c0_39, %c0_40] : memref<1x16xf32, #tpu.memory_space<vmem>>, vector<1x16xf32>
    %84 = vector.broadcast %83 : vector<1x16xf32> to vector<8x16xf32>
    %85 = arith.addf %82, %84 : vector<8x16xf32>
    %cst_41 = arith.constant 0.000000e+00 : f32
    %86 = vector.broadcast %cst_41 : f32 to vector<8x16xf32>
    %87 = arith.maximumf %85, %86 : vector<8x16xf32>
    %c0_42 = arith.constant 0 : index
    %c0_43 = arith.constant 0 : index
    %88 = vector.load %arg12[%c0_42, %c0_43] : memref<16x16xf32, #tpu.memory_space<vmem>>, vector<16x16xf32>
    %cst_44 = arith.constant dense<0.000000e+00> : vector<8x16xf32>
    %89 = tpu.matmul %87, %88, %cst_44 {dimension_numbers = #tpu.dot_dimension_numbers<[1], [0], [0], [1], [0, 0, 1, 1], [], []>} : vector<8x16xf32>, vector<16x16xf32>, vector<8x16xf32> -> vector<8x16xf32>
    %c0_45 = arith.constant 0 : index
    %c0_46 = arith.constant 0 : index
    %90 = vector.load %arg13[%c0_45, %c0_46] : memref<1x16xf32, #tpu.memory_space<vmem>>, vector<1x16xf32>
    %91 = vector.broadcast %90 : vector<1x16xf32> to vector<8x16xf32>
    %92 = arith.addf %89, %91 : vector<8x16xf32>
    %cst_47 = arith.constant 0.000000e+00 : f32
    %93 = vector.broadcast %cst_47 : f32 to vector<8x16xf32>
    %94 = arith.maximumf %92, %93 : vector<8x16xf32>
    %c0_48 = arith.constant 0 : index
    %c0_49 = arith.constant 0 : index
    %95 = vector.load %arg14[%c0_48, %c0_49] : memref<16x8xf32, #tpu.memory_space<vmem>>, vector<16x8xf32>
    %cst_50 = arith.constant dense<0.000000e+00> : vector<8x8xf32>
    %96 = tpu.matmul %94, %95, %cst_50 {dimension_numbers = #tpu.dot_dimension_numbers<[1], [0], [0], [1], [0, 0, 1, 1], [], []>} : vector<8x16xf32>, vector<16x8xf32>, vector<8x8xf32> -> vector<8x8xf32>
    %c0_51 = arith.constant 0 : index
    %c0_52 = arith.constant 0 : index
    %97 = vector.load %arg15[%c0_51, %c0_52] : memref<1x8xf32, #tpu.memory_space<vmem>>, vector<1x8xf32>
    %98 = vector.broadcast %97 : vector<1x8xf32> to vector<8x8xf32>
    %99 = arith.addf %96, %98 : vector<8x8xf32>
    %100 = tpu.transpose %99, [1, 0] : vector<8x8xf32> -> vector<8x8xf32>
    %c0_53 = arith.constant 0 : index
    %c0_54 = arith.constant 0 : index
    %101 = vector.load %arg16[%c0_53, %c0_54] : memref<8x8xf32, #tpu.memory_space<vmem>>, vector<8x8xf32>
    tpu.vector_store %arg16[%c0_53, %c0_54], %100 {strides = array<i32>} : memref<8x8xf32, #tpu.memory_space<vmem>>, vector<8x8xf32>,
    return
  }
  func.func @transform_0(%arg0: i32) -> (i32, i32, i32) {
    %c0_i32 = arith.constant 0 : i32
    %c0_i32_0 = arith.constant 0 : i32
    %c0_i32_1 = arith.constant 0 : i32
    return %arg0, %c0_i32, %c0_i32_0 : i32, i32, i32
  }
  func.func @transform_1(%arg0: i32) -> (i32, i32) {
    %c0_i32 = arith.constant 0 : i32
    %c0_i32_0 = arith.constant 0 : i32
    %c0_i32_1 = arith.constant 0 : i32
    return %c0_i32, %c0_i32_0 : i32, i32
  }
  func.func @transform_2(%arg0: i32) -> (i32, i32) {
    %c0_i32 = arith.constant 0 : i32
    %c0_i32_0 = arith.constant 0 : i32
    %c0_i32_1 = arith.constant 0 : i32
    return %c0_i32, %c0_i32_0 : i32, i32
  }
  func.func @transform_3(%arg0: i32) -> (i32, i32) {
    %c0_i32 = arith.constant 0 : i32
    %c0_i32_0 = arith.constant 0 : i32
    %c0_i32_1 = arith.constant 0 : i32
    return %c0_i32, %c0_i32_0 : i32, i32
  }
  func.func @transform_4(%arg0: i32) -> (i32, i32) {
    %c0_i32 = arith.constant 0 : i32
    %c0_i32_0 = arith.constant 0 : i32
    %c0_i32_1 = arith.constant 0 : i32
    return %c0_i32, %c0_i32_0 : i32, i32
  }
  func.func @transform_5(%arg0: i32) -> (i32, i32) {
    %c0_i32 = arith.constant 0 : i32
    %c0_i32_0 = arith.constant 0 : i32
    %c0_i32_1 = arith.constant 0 : i32
    return %c0_i32, %c0_i32_0 : i32, i32
  }
  func.func @transform_6(%arg0: i32) -> (i32, i32) {
    %c0_i32 = arith.constant 0 : i32
    %c0_i32_0 = arith.constant 0 : i32
    %c0_i32_1 = arith.constant 0 : i32
    return %c0_i32, %c0_i32_0 : i32, i32
  }
  func.func @transform_7(%arg0: i32) -> (i32, i32) {
    %c0_i32 = arith.constant 0 : i32
    %c0_i32_0 = arith.constant 0 : i32
    %c0_i32_1 = arith.constant 0 : i32
    return %c0_i32, %c0_i32_0 : i32, i32
  }
  func.func @transform_8(%arg0: i32) -> (i32, i32) {
    %c0_i32 = arith.constant 0 : i32
    %c0_i32_0 = arith.constant 0 : i32
    %c0_i32_1 = arith.constant 0 : i32
    return %c0_i32, %c0_i32_0 : i32, i32
  }
  func.func @transform_9(%arg0: i32) -> (i32, i32) {
    %c0_i32 = arith.constant 0 : i32
    %c0_i32_0 = arith.constant 0 : i32
    %c0_i32_1 = arith.constant 0 : i32
    return %c0_i32, %c0_i32_0 : i32, i32
  }
  func.func @transform_10(%arg0: i32) -> (i32, i32) {
    %c0_i32 = arith.constant 0 : i32
    %c0_i32_0 = arith.constant 0 : i32
    %c0_i32_1 = arith.constant 0 : i32
    return %c0_i32, %c0_i32_0 : i32, i32
  }
  func.func @transform_11(%arg0: i32) -> (i32, i32) {
    %c0_i32 = arith.constant 0 : i32
    %c0_i32_0 = arith.constant 0 : i32
    %c0_i32_1 = arith.constant 0 : i32
    return %c0_i32, %c0_i32_0 : i32, i32
  }
  func.func @transform_12(%arg0: i32) -> (i32, i32) {
    %c0_i32 = arith.constant 0 : i32
    %c0_i32_0 = arith.constant 0 : i32
    %c0_i32_1 = arith.constant 0 : i32
    return %c0_i32, %c0_i32_0 : i32, i32
  }
  func.func @transform_13(%arg0: i32) -> (i32, i32) {
    %c0_i32 = arith.constant 0 : i32
    %c0_i32_0 = arith.constant 0 : i32
    %c0_i32_1 = arith.constant 0 : i32
    return %c0_i32, %c0_i32_0 : i32, i32
  }
  func.func @transform_14(%arg0: i32) -> (i32, i32) {
    %c0_i32 = arith.constant 0 : i32
    %c0_i32_0 = arith.constant 0 : i32
    %c0_i32_1 = arith.constant 0 : i32
    return %c0_i32, %c0_i32_0 : i32, i32
  }
  func.func @transform_15(%arg0: i32) -> (i32, i32) {
    %c0_i32 = arith.constant 0 : i32
    %c0_i32_0 = arith.constant 0 : i32
    return %c0_i32, %arg0 : i32, i32
  }
}

</mosaic_0001>

<bundles_post_ra>
// kernel: cnn_lite_forward.1
= control target key start
LH: loop header
LB: loop body
LE: loop exit
PB: predicated region body
PF: predicated region fallthrough
CT: control target
= control target key end

     0   :  { %vm131_vm0 = vcmask 1046528   ;;  %s2770_s22 = smov 2   ;;  %s2771_s27 = smov 4   ;;  %vm367_vm1 = vcmask 1045504   ;;  %vm82_vm2 = vcmask 1040384   ;;  %vm276_vm3 = vcmask 15360   ;;  %s3961_s0 = inlined_call_operand.vmem [shape: f32[8,16,2], index: 0, kind: input, shape index: {}]   ;;  %s3962_s1 = inlined_call_operand.vmem [shape: f32[6,4], index: 1, kind: input, shape index: {}]   ;;  %s3963_s3 = inlined_call_operand.vmem [shape: f32[12,8], index: 3, kind: input, shape index: {}]   ;;  %s3964_s2 = inlined_call_operand.vmem [shape: f32[1,4], index: 2, kind: input, shape index: {}]   ;;  %s3965_s5 = inlined_call_operand.vmem [shape: f32[24,16], index: 5, kind: input, shape index: {}]   ;;  %s3966_s4 = inlined_call_operand.vmem [shape: f32[1,8], index: 4, kind: input, shape index: {}]   ;;  %s3967_s7 = inlined_call_operand.vmem [shape: f32[48,32], index: 7, kind: input, shape index: {}]   ;;  %s3968_s6 = inlined_call_operand.vmem [shape: f32[1,16], index: 6, kind: input, shape index: {}]   ;;  %s3969_s9 = inlined_call_operand.vmem [shape: f32[32,16], index: 9, kind: input, shape index: {}]   ;;  %s3970_s11 = inlined_call_operand.vmem [shape: f32[16,16], index: 11, kind: input, shape index: {}]   ;;  %s3971_s8 = inlined_call_operand.vmem [shape: f32[1,32], index: 8, kind: input, shape index: {}]   ;;  %s3972_s10 = inlined_call_operand.vmem [shape: f32[1,16], index: 10, kind: input, shape index: {}]   ;;  %s3973_s13 = inlined_call_operand.vmem [shape: f32[16,8], index: 13, kind: input, shape index: {}]   ;;  %s3974_s12 = inlined_call_operand.vmem [shape: f32[1,16], index: 12, kind: input, shape index: {}]   ;;  %s3975_s14 = inlined_call_operand.vmem [shape: f32[1,8], index: 14, kind: input, shape index: {}]   ;;  %s3976_s15 = inlined_call_operand.vmem [shape: f32[8,8], index: 15, kind: output, shape index: {}]  }
   0x1   :  { %v2862_v0 = vld [vmem:[%s3961_s0] sm:$0xff]  ;;  %v51_v1 = vld [vmem:[%s3961_s0 + $0x8] sm:$0xff]  ;;  %v2874_v5 = vld [vmem:[%s3961_s0 + $0x10] sm:$0xff]  ;;  %vm293_vm4 = vcmask 31744   ;;  %vm318_vm5 = vcmask 48128   ;;  %vm831_vm6 = vcmask 1043456  }
   0x2   :  { %172 = vrot.lane.b32.xlu0 %v2862_v0, %s2770_s22  ;;  %v132_v2 = vrot.slane %v2862_v0, 1  ;;  %v133_v3 = vrot.slane %v51_v1, 1  ;;  %v53_v6 = vld [vmem:[%s3961_s0 + $0x18] sm:$0xff]  ;;  %v135_v8 = vrot.slane %v2874_v5, 1  ;;  %v310_v10 = vld [vmem:[%s3962_s1] sm:$0x3f] }
   0x3   :  { %v136_v9 = vrot.slane %v53_v6, 1  ;;  %2582 = vmatprep.subr.msk.mxu0 %vm367_vm1, %v310_v10  ;;  %v2891_v11 = vld [vmem:[%s3961_s0 + $0x20] sm:$0xff]  ;;  %v86_v12 = vrot.slane %v2874_v5, 7  ;;  %v87_v13 = vrot.slane %v53_v6, 7  ;;  %v55_v15 = vld [vmem:[%s3961_s0 + $0x28] sm:$0xff]  ;;  %v2904_v16 = vld [vmem:[%s3961_s0 + $0x30] sm:$0xff] }
   0x4   :  { %v134_v4 = vsel %vm131_vm0, %v132_v2, %v133_v3  ;;  %v164_v7 = vsel %vm131_vm0, %v133_v3, 0.0  ;;  %2583 = vmatpush3.msk.msra.mxu0 %vm367_vm1, %v310_v10  ;;  %v89_v14 = vrot.slane %v2891_v11, 7  ;;  %v57_v17 = vld [vmem:[%s3961_s0 + $0x38] sm:$0xff]  ;;  %v90_v19 = vrot.slane %v55_v15, 7  ;;  %v2939_v31 = vld [vmem:[%s3961_s0 + $0x40] sm:$0xff]  ;;  %v59_v32 = vld [vmem:[%s3961_s0 + $0x48] sm:$0xff] }
   0x5   :  { %228 = vrot.lane.b32.xlu1 %v134_v4, %s2771_s27  ;;  %v137_v18 = vsel %vm131_vm0, %v135_v8, %v136_v9  ;;  %v92_v20 = vrot.slane %v2904_v16, 7  ;;  %v93_v21 = vrot.slane %v57_v17, 7  ;;  %v83_v22 = vrot.slane %v2862_v0, 7  ;;  %v2961_v40 = vld [vmem:[%s3961_s0 + $0x50] sm:$0xff]  ;;  %v61_v41 = vld [vmem:[%s3961_s0 + $0x58] sm:$0xff]  ;;  %v2983_v49 = vld [vmem:[%s3961_s0 + $0x60] sm:$0xff] }
   0x6   :  { %174 = vrot.lane.b32.xlu0 %v51_v1, %s2770_s22  ;;  %v84_v23 = vrot.slane %v51_v1, 7  ;;  %v165_v24 = vsel %vm131_vm0, %v136_v9, 0.0  ;;  %v138_v25 = vrot.slane %v2891_v11, 1  ;;  %v2919_v26 = vsel %vm82_vm2, %v86_v12, %v87_v13  ;;  %v63_v50 = vld [vmem:[%s3961_s0 + $0x68] sm:$0xff]  ;;  %v3005_v58 = vld [vmem:[%s3961_s0 + $0x70] sm:$0xff]  ;;  %v65_v59 = vld [vmem:[%s3961_s0 + $0x78] sm:$0xff] }
   0x7   :  { %v139_v27 = vrot.slane %v55_v15, 1  ;;  %v2929_v29 = vsel %vm82_vm2, %v89_v14, %v90_v19  ;;  %v2934_v30 = vsel %vm82_vm2, %v92_v20, %v93_v21  ;;  %v95_v33 = vrot.slane %v2939_v31, 7 }
   0x8   :  { %v2924_v28 = vsel %vm82_vm2, %v83_v22, %v84_v23  ;;  %v96_v34 = vrot.slane %v59_v32, 7  ;;  %v141_v38 = vrot.slane %v2904_v16, 1  ;;  %v142_v39 = vrot.slane %v57_v17, 1 }
   0x9   :  { %230 = vrot.lane.b32.xlu1 %v164_v7, %s2771_s27  ;;  %v140_v35 = vsel %vm131_vm0, %v138_v25, %v139_v27  ;;  %v166_v37 = vsel %vm131_vm0, %v139_v27, 0.0  ;;  %v98_v42 = vrot.slane %v2961_v40, 7  ;;  %v99_v43 = vrot.slane %v61_v41, 7 }
   0xa   :  { %176 = vrot.lane.b32.xlu0 %v2874_v5, %s2770_s22  ;;  %v2953_v36 = vsel %vm82_vm2, %v95_v33, %v96_v34  ;;  %v143_v44 = vsel %vm131_vm0, %v141_v38, %v142_v39  ;;  %v167_v46 = vsel %vm131_vm0, %v142_v39, 0.0  ;;  %v144_v47 = vrot.slane %v2939_v31, 1 }
   0xb   :  { %v2975_v45 = vsel %vm82_vm2, %v98_v42, %v99_v43  ;;  %v145_v48 = vrot.slane %v59_v32, 1  ;;  %v101_v51 = vrot.slane %v2983_v49, 7  ;;  %v102_v52 = vrot.slane %v63_v50, 7 }
   0xc   :  { %v147_v56 = vrot.slane %v2961_v40, 1  ;;  %v148_v57 = vrot.slane %v61_v41, 1  ;;  %v104_v60 = vrot.slane %v3005_v58, 7  ;;  %v105_v61 = vrot.slane %v65_v59, 7 }
   0xd   :  { %178 = vrot.lane.b32.xlu1 %v53_v6, %s2770_s22  ;;  %v146_v53 = vsel %vm131_vm0, %v144_v47, %v145_v48  ;;  %v2997_v54 = vsel %vm82_vm2, %v101_v51, %v102_v52  ;;  %v168_v55 = vsel %vm131_vm0, %v145_v48, 0.0  ;;  %v150_v2 = vrot.slane %v2983_v49, 1 }
   0xe   :  { %232 = vrot.lane.b32.xlu0 %v137_v18, %s2771_s27  ;;  %v149_v62 = vsel %vm131_vm0, %v147_v56, %v148_v57  ;;  %v3019_v63 = vsel %vm82_vm2, %v104_v60, %v105_v61  ;;  %v169_v1 = vsel %vm131_vm0, %v148_v57, 0.0  ;;  %v151_v3 = vrot.slane %v63_v50, 1 }
   0xf   :  { %v153_v7 = vrot.slane %v3005_v58, 1  ;;  %v154_v8 = vrot.slane %v65_v59, 1  ;;  %v123_v13 = vsel %vm82_vm2, 0.0, %v83_v22  ;;  %v124_v0 = vsel %vm82_vm2, 0.0, %v86_v12 }
  0x10   :  { %v152_v4 = vsel %vm131_vm0, %v150_v2, %v151_v3  ;;  %v170_v6 = vsel %vm131_vm0, %v151_v3, 0.0  ;;  %v125_v5 = vsel %vm82_vm2, 0.0, %v89_v14  ;;  %vm2772_vm7 = vmmov 1  }
  0x11   :  { %234 = vrot.lane.b32.xlu1 %v165_v24, %s2771_s27  ;;  %v155_v9 = vsel %vm131_vm0, %v153_v7, %v154_v8  ;;  %v171_v10 = vsel %vm131_vm0, %v154_v8, 0.0  ;;  %vm2728_vm8 = vmpackc.low %vm831_vm6, %vm2772_vm7  ;;  %vm756_vm9 = vcmask 64512   ;;  %vm782_vm10 = vcmask 97280  }
  0x12   :  { %180 = vrot.lane.b32.xlu0 %v2891_v11, %s2770_s22  ;;  %v126_v11 = vsel %vm82_vm2, 0.0, %v92_v20  ;;  %vm1092_vm11 = vcmask 1041408   ;;  %vm1301_vm12 = vcmask 130048   ;;  %vm1328_vm13 = vcmask 195584  }
  0x13   :  { %vm1762_vm14 = vcmask 261120   ;;  %vm1792_vm15 = vcmask 392192   ;;  %vm2134_vm6 = vcmask 1044484   ;;  %vm2136_vm7 = vcmask 1045509  }
  0x15   :  { %182 = vrot.lane.b32.xlu1 %v55_v15, %s2770_s22 }
  0x16   :  { %236 = vrot.lane.b32.xlu0 %v140_v35, %s2771_s27 }
  0x19   :  { %238 = vrot.lane.b32.xlu1 %v166_v37, %s2771_s27 }
  0x1a   :  { %184 = vrot.lane.b32.xlu0 %v2904_v16, %s2770_s22  ;;  %v127_v16 = vsel %vm82_vm2, 0.0, %v95_v33 }
  0x1d   :  { %186 = vrot.lane.b32.xlu1 %v57_v17, %s2770_s22 }
  0x1e   :  { %240 = vrot.lane.b32.xlu0 %v143_v44, %s2771_s27 }
  0x21   :  { %242 = vrot.lane.b32.xlu1 %v167_v46, %s2771_s27 }
  0x22   :  { %188 = vrot.lane.b32.xlu0 %v2939_v31, %s2770_s22  ;;  %v128_v31 = vsel %vm82_vm2, 0.0, %v98_v42 }
  0x25   :  { %190 = vrot.lane.b32.xlu1 %v59_v32, %s2770_s22 }
  0x26   :  { %244 = vrot.lane.b32.xlu0 %v146_v53, %s2771_s27 }
  0x29   :  { %246 = vrot.lane.b32.xlu1 %v168_v55, %s2771_s27 }
  0x2a   :  { %192 = vrot.lane.b32.xlu0 %v2961_v40, %s2770_s22  ;;  %v129_v40 = vsel %vm82_vm2, 0.0, %v101_v51 }
  0x2d   :  { %194 = vrot.lane.b32.xlu1 %v61_v41, %s2770_s22 }
  0x2e   :  { %248 = vrot.lane.b32.xlu0 %v149_v62, %s2771_s27 }
  0x31   :  { %250 = vrot.lane.b32.xlu1 %v169_v1, %s2771_s27 }
  0x32   :  { %196 = vrot.lane.b32.xlu0 %v2983_v49, %s2770_s22  ;;  %v130_v49 = vsel %vm82_vm2, 0.0, %v104_v60  ;;  %v773_v60 = vld [vmem:[%s3963_s3] sm:$0xff] }
  0x35   :  { %198 = vrot.lane.b32.xlu1 %v63_v50, %s2770_s22 }
  0x36   :  { %252 = vrot.lane.b32.xlu0 %v152_v4, %s2771_s27 }
  0x39   :  { %254 = vrot.lane.b32.xlu1 %v170_v6, %s2771_s27 }
  0x3a   :  { %200 = vrot.lane.b32.xlu0 %v3005_v58, %s2770_s22 }
  0x3d   :  { %202 = vrot.lane.b32.xlu1 %v65_v59, %s2770_s22 }
  0x3e   :  { %256 = vrot.lane.b32.xlu0 %v155_v9, %s2771_s27 }
  0x41   :  { %258 = vrot.lane.b32.xlu1 %v171_v10, %s2771_s27 }
  0x74   :  { %v173_v15 = vpop.permute.xlu0 %172 }
  0x75   :  { %v277_v17 = vsel %vm276_vm3, %v123_v13, %v173_v15 }
  0x77   :  { %v229_v18 = vpop.permute.xlu1 %228 }
  0x78   :  { %v175_v19 = vpop.permute.xlu0 %174  ;;  %v294_v21 = vsel %vm293_vm4, %v277_v17, %v229_v18 }
  0x79   :  { %v278_v23 = vsel %vm276_vm3, %v2924_v28, %v175_v19  ;;  %2584 = vmatprep.mubr.msk.f32.mxu0 %vm318_vm5, %v294_v21 }
  0x7b   :  { %v231_v24 = vpop.permute.xlu1 %230 }
  0x7c   :  { %v295_v22 = vsel %vm293_vm4, %v278_v23, %v231_v24  ;;  %v177_v25 = vpop.permute.xlu0 %176 }
  0x7d   :  { %2585 = vmatmul.mubr.msk.f32.vlgmr.msra.gmra.mrb[0].mxu0 %vm318_vm5, %v295_v22  ;;  %v279_v27 = vsel %vm276_vm3, %v124_v0, %v177_v25  ;;  %v774_v25 = vld [vmem:[%s3963_s3 + $0x8] sm:$0xf] }
  0x7f   :  { %v179_v32 = vpop.permute.xlu1 %178 }
  0x80   :  { %v233_v34 = vpop.permute.xlu0 %232  ;;  %v280_v28 = vsel %vm276_vm3, %v2919_v26, %v179_v32 }
  0x81   :  { %v296_v35 = vsel %vm293_vm4, %v279_v27, %v233_v34  ;;  %v2727_v27 = vpack.c.bf16 %v774_v25, %v773_v60 }
  0x82   :  { %2587 = vmatprep.mubr.msk.f32.mxu0 %vm318_vm5, %v296_v35 }
  0x83   :  { %v235_v37 = vpop.permute.xlu1 %234  ;;  %2729 = vmatprep.subr.msk.bf16.mxu1 %vm2728_vm8, %v2727_v27 }
  0x84   :  { %v297_v12 = vsel %vm293_vm4, %v280_v28, %v235_v37  ;;  %v181_v38 = vpop.permute.xlu0 %180  ;;  %2732 = vmatpush3.bf16.msk.msra.mxu1 %vm2728_vm8, %v2727_v27  ;;  %vm2138_vm8 = vcmask 1046534  }
  0x85   :  { %2588 = vmatmul.mubr.msk.f32.gmra.mrb[2].mxu0 %vm318_vm5, %v297_v12  ;;  %v281_v39 = vsel %vm276_vm3, %v125_v5, %v181_v38 }
  0x87   :  { %v183_v41 = vpop.permute.xlu1 %182 }
  0x88   :  { %v237_v43 = vpop.permute.xlu0 %236  ;;  %v282_v26 = vsel %vm276_vm3, %v2929_v29, %v183_v41 }
  0x89   :  { %v298_v44 = vsel %vm293_vm4, %v281_v39, %v237_v43 }
  0x8a   :  { %2590 = vmatprep.mubr.msk.f32.mxu0 %vm318_vm5, %v298_v44 }
  0x8b   :  { %v239_v46 = vpop.permute.xlu1 %238 }
  0x8c   :  { %v299_v14 = vsel %vm293_vm4, %v282_v26, %v239_v46  ;;  %v185_v47 = vpop.permute.xlu0 %184 }
  0x8d   :  { %2591 = vmatmul.mubr.msk.f32.gmra.mrb[4].mxu0 %vm318_vm5, %v299_v14  ;;  %v283_v48 = vsel %vm276_vm3, %v126_v11, %v185_v47 }
  0x8f   :  { %v187_v50 = vpop.permute.xlu1 %186 }
  0x90   :  { %v241_v52 = vpop.permute.xlu0 %240  ;;  %v284_v29 = vsel %vm276_vm3, %v2934_v30, %v187_v50 }
  0x91   :  { %v300_v53 = vsel %vm293_vm4, %v283_v48, %v241_v52 }
  0x92   :  { %2593 = vmatprep.mubr.msk.f32.mxu0 %vm318_vm5, %v300_v53 }
  0x93   :  { %v243_v55 = vpop.permute.xlu1 %242 }
  0x94   :  { %v301_v20 = vsel %vm293_vm4, %v284_v29, %v243_v55  ;;  %v189_v56 = vpop.permute.xlu0 %188 }
  0x95   :  { %2594 = vmatmul.mubr.msk.f32.gmra.mrb[6].mxu0 %vm318_vm5, %v301_v20  ;;  %v285_v57 = vsel %vm276_vm3, %v127_v16, %v189_v56 }
  0x97   :  { %v191_v59 = vpop.permute.xlu1 %190 }
  0x98   :  { %v245_v61 = vpop.permute.xlu0 %244  ;;  %v286_v30 = vsel %vm276_vm3, %v2953_v36, %v191_v59 }
  0x99   :  { %v302_v62 = vsel %vm293_vm4, %v285_v57, %v245_v61 }
  0x9a   :  { %2596 = vmatprep.mubr.msk.f32.mxu0 %vm318_vm5, %v302_v62 }
  0x9b   :  { %v247_v1 = vpop.permute.xlu1 %246 }
  0x9c   :  { %v303_v33 = vsel %vm293_vm4, %v286_v30, %v247_v1  ;;  %v193_v2 = vpop.permute.xlu0 %192 }
  0x9d   :  { %2597 = vmatmul.mubr.msk.f32.gmra.mrb[8].mxu0 %vm318_vm5, %v303_v33  ;;  %v287_v3 = vsel %vm276_vm3, %v128_v31, %v193_v2 }
  0x9f   :  { %v195_v4 = vpop.permute.xlu1 %194 }
  0xa0   :  { %v249_v6 = vpop.permute.xlu0 %248  ;;  %v288_v36 = vsel %vm276_vm3, %v2975_v45, %v195_v4 }
  0xa1   :  { %v304_v7 = vsel %vm293_vm4, %v287_v3, %v249_v6 }
  0xa2   :  { %2599 = vmatprep.mubr.msk.f32.mxu0 %vm318_vm5, %v304_v7 }
  0xa3   :  { %v251_v8 = vpop.permute.xlu1 %250 }
  0xa4   :  { %v305_v42 = vsel %vm293_vm4, %v288_v36, %v251_v8  ;;  %v197_v9 = vpop.permute.xlu0 %196 }
  0xa5   :  { %2600 = vmatmul.mubr.msk.f32.gmra.mrb[10].mxu0 %vm318_vm5, %v305_v42  ;;  %v289_v10 = vsel %vm276_vm3, %v129_v40, %v197_v9 }
  0xa7   :  { %v199_v13 = vpop.permute.xlu1 %198 }
  0xa8   :  { %v253_v15 = vpop.permute.xlu0 %252  ;;  %v290_v45 = vsel %vm276_vm3, %v2997_v54, %v199_v13 }
  0xa9   :  { %v306_v17 = vsel %vm293_vm4, %v289_v10, %v253_v15 }
  0xaa   :  { %2602 = vmatprep.mubr.msk.f32.mxu0 %vm318_vm5, %v306_v17 }
  0xab   :  { %v255_v18 = vpop.permute.xlu1 %254 }
  0xac   :  { %v307_v51 = vsel %vm293_vm4, %v290_v45, %v255_v18  ;;  %v201_v19 = vpop.permute.xlu0 %200 }
  0xad   :  { %2603 = vmatmul.mubr.msk.f32.gmra.mrb[12].mxu0 %vm318_vm5, %v307_v51  ;;  %v291_v21 = vsel %vm276_vm3, %v130_v49, %v201_v19 }
  0xaf   :  { %v203_v23 = vpop.permute.xlu1 %202 }
  0xb0   :  { %v257_v24 = vpop.permute.xlu0 %256  ;;  %v292_v54 = vsel %vm276_vm3, %v3019_v63, %v203_v23  ;;  %v3129_v63 = vld [vmem:[%s3964_s2] ss:$0 sm:$0xff]  ;;  %s2773_s2 = smov 8   ;;  %vm2128_vm3 = vcmask 1041409  }
  0xb1   :  { %v308_v0 = vsel %vm293_vm4, %v291_v21, %v257_v24 }
  0xb2   :  { %2605 = vmatprep.mubr.msk.f32.mxu0 %vm318_vm5, %v308_v0 }
  0xb3   :  { %v259_v22 = vpop.permute.xlu1 %258 }
  0xb4   :  { %v309_v58 = vsel %vm293_vm4, %v292_v54, %v259_v22 }
  0xb5   :  { %2606 = vmatmul.mubr.msk.f32.gmra.mrb[14].mxu0 %vm318_vm5, %v309_v58  ;;  %vm2132_vm5 = vcmask 1043459  }
 0x150   :  { %v2586_v32 = vpop.f32.mrb[0].mxu0 }
 0x151   :  { %v443_v34 = vadd.f32 %v2586_v32, %v3129_v63  ;;  %v437_v35 = vpop.f32.mrb[1].mxu0 }
 0x152   :  { %v438_v28 = vadd.f32 %v3129_v63, %v437_v35 }
 0x153   :  { %v517_v37 = vmax.f32 %v443_v34, 0.0 }
 0x154   :  { %v3133_v5 = vmax.f32 %v438_v28, 0.0 }
 0x155   :  { %v549_v12 = vrot.slane %v517_v37, 7  ;;  %638 = vrot.lane.b32.xlu1 %v517_v37, %s2771_s27  ;;  %v597_v38 = vrot.slane %v517_v37, 1 }
 0x156   :  { %v548_v39 = vrot.slane %v3133_v5, 7  ;;  %v596_v41 = vrot.slane %v3133_v5, 1  ;;  %636 = vrot.lane.b32.xlu0 %v3133_v5, %s2771_s27 }
 0x157   :  { %v628_v43 = vsel %vm131_vm0, %v597_v38, 0.0 }
 0x158   :  { %v2589_v44 = vpop.f32.mrb[2].mxu0  ;;  %v598_v26 = vsel %vm131_vm0, %v596_v41, %v597_v38  ;;  %v3145_v46 = vsel %vm82_vm2, %v548_v39, %v549_v12 }
 0x159   :  { %v453_v11 = vadd.f32 %v2589_v44, %v3129_v63  ;;  %694 = vrot.lane.b32.xlu1 %v628_v43, %s2773_s2  ;;  %v447_v14 = vpop.f32.mrb[3].mxu0 }
 0x15a   :  { %v448_v47 = vadd.f32 %v3129_v63, %v447_v14  ;;  %692 = vrot.lane.b32.xlu0 %v598_v26, %s2773_s2 }
 0x15b   :  { %v519_v48 = vmax.f32 %v453_v11, 0.0 }
 0x15c   :  { %v3151_v50 = vmax.f32 %v448_v47, 0.0 }
 0x15d   :  { %v552_v52 = vrot.slane %v519_v48, 7  ;;  %642 = vrot.lane.b32.xlu1 %v519_v48, %s2771_s27  ;;  %v600_v53 = vrot.slane %v519_v48, 1 }
 0x15e   :  { %v551_v29 = vrot.slane %v3151_v50, 7  ;;  %v599_v55 = vrot.slane %v3151_v50, 1  ;;  %640 = vrot.lane.b32.xlu0 %v3151_v50, %s2771_s27 }
 0x15f   :  { %v629_v16 = vsel %vm131_vm0, %v600_v53, 0.0 }
 0x160   :  { %v2592_v20 = vpop.f32.mrb[4].mxu0  ;;  %v601_v56 = vsel %vm131_vm0, %v599_v55, %v600_v53  ;;  %v3163_v57 = vsel %vm82_vm2, %v551_v29, %v552_v52 }
 0x161   :  { %v463_v59 = vadd.f32 %v2592_v20, %v3129_v63  ;;  %698 = vrot.lane.b32.xlu1 %v629_v16, %s2773_s2  ;;  %v457_v61 = vpop.f32.mrb[5].mxu0 }
 0x162   :  { %v458_v62 = vadd.f32 %v3129_v63, %v457_v61  ;;  %696 = vrot.lane.b32.xlu0 %v601_v56, %s2773_s2 }
 0x163   :  { %v521_v30 = vmax.f32 %v463_v59, 0.0 }
 0x164   :  { %v3169_v1 = vmax.f32 %v458_v62, 0.0 }
 0x165   :  { %v555_v31 = vrot.slane %v521_v30, 7  ;;  %646 = vrot.lane.b32.xlu1 %v521_v30, %s2771_s27  ;;  %v603_v33 = vrot.slane %v521_v30, 1 }
 0x166   :  { %v554_v2 = vrot.slane %v3169_v1, 7  ;;  %v602_v3 = vrot.slane %v3169_v1, 1  ;;  %644 = vrot.lane.b32.xlu0 %v3169_v1, %s2771_s27 }
 0x167   :  { %v630_v4 = vsel %vm131_vm0, %v603_v33, 0.0 }
 0x168   :  { %v2595_v6 = vpop.f32.mrb[6].mxu0  ;;  %v604_v7 = vsel %vm131_vm0, %v602_v3, %v603_v33  ;;  %v3181_v36 = vsel %vm82_vm2, %v554_v2, %v555_v31  ;;  %v590_v50 = vsel %vm82_vm2, 0.0, %v554_v2 }
 0x169   :  { %v473_v8 = vadd.f32 %v2595_v6, %v3129_v63  ;;  %702 = vrot.lane.b32.xlu1 %v630_v4, %s2773_s2  ;;  %v467_v40 = vpop.f32.mrb[7].mxu0 }
 0x16a   :  { %v468_v42 = vadd.f32 %v3129_v63, %v467_v40  ;;  %700 = vrot.lane.b32.xlu0 %v604_v7, %s2773_s2 }
 0x16b   :  { %v523_v9 = vmax.f32 %v473_v8, 0.0 }
 0x16c   :  { %v3187_v10 = vmax.f32 %v468_v42, 0.0 }
 0x16d   :  { %v558_v13 = vrot.slane %v523_v9, 7  ;;  %650 = vrot.lane.b32.xlu1 %v523_v9, %s2771_s27  ;;  %v606_v15 = vrot.slane %v523_v9, 1 }
 0x16e   :  { %v557_v17 = vrot.slane %v3187_v10, 7  ;;  %v605_v45 = vrot.slane %v3187_v10, 1  ;;  %648 = vrot.lane.b32.xlu0 %v3187_v10, %s2771_s27 }
 0x16f   :  { %v631_v18 = vsel %vm131_vm0, %v606_v15, 0.0 }
 0x170   :  { %v2598_v49 = vpop.f32.mrb[8].mxu0  ;;  %v607_v51 = vsel %vm131_vm0, %v605_v45, %v606_v15  ;;  %v3199_v19 = vsel %vm82_vm2, %v557_v17, %v558_v13  ;;  %v591_v1 = vsel %vm82_vm2, 0.0, %v557_v17 }
 0x171   :  { %v483_v21 = vadd.f32 %v2598_v49, %v3129_v63  ;;  %706 = vrot.lane.b32.xlu1 %v631_v18, %s2773_s2  ;;  %v477_v23 = vpop.f32.mrb[9].mxu0 }
 0x172   :  { %v478_v24 = vadd.f32 %v3129_v63, %v477_v23  ;;  %704 = vrot.lane.b32.xlu0 %v607_v51, %s2773_s2  ;;  %v588_v23 = vsel %vm82_vm2, 0.0, %v548_v39  ;;  %v589_v39 = vsel %vm82_vm2, 0.0, %v551_v29 }
 0x173   :  { %v525_v0 = vmax.f32 %v483_v21, 0.0 }
 0x174   :  { %v3205_v54 = vmax.f32 %v478_v24, 0.0 }
 0x175   :  { %v561_v22 = vrot.slane %v525_v0, 7  ;;  %654 = vrot.lane.b32.xlu1 %v525_v0, %s2771_s27  ;;  %v609_v58 = vrot.slane %v525_v0, 1 }
 0x176   :  { %v560_v60 = vrot.slane %v3205_v54, 7  ;;  %v608_v25 = vrot.slane %v3205_v54, 1  ;;  %652 = vrot.lane.b32.xlu0 %v3205_v54, %s2771_s27 }
 0x177   :  { %v632_v27 = vsel %vm131_vm0, %v609_v58, 0.0 }
 0x178   :  { %v2601_v32 = vpop.f32.mrb[10].mxu0  ;;  %v610_v34 = vsel %vm131_vm0, %v608_v25, %v609_v58  ;;  %v3217_v35 = vsel %vm82_vm2, %v560_v60, %v561_v22  ;;  %v592_v10 = vsel %vm82_vm2, 0.0, %v560_v60 }
 0x179   :  { %v493_v28 = vadd.f32 %v2601_v32, %v3129_v63  ;;  %710 = vrot.lane.b32.xlu1 %v632_v27, %s2773_s2  ;;  %v487_v37 = vpop.f32.mrb[11].mxu0 }
 0x17a   :  { %v488_v12 = vadd.f32 %v3129_v63, %v487_v37  ;;  %708 = vrot.lane.b32.xlu0 %v610_v34, %s2773_s2 }
 0x17b   :  { %v527_v38 = vmax.f32 %v493_v28, 0.0 }
 0x17c   :  { %v3223_v41 = vmax.f32 %v488_v12, 0.0 }
 0x17d   :  { %v564_v43 = vrot.slane %v527_v38, 7  ;;  %658 = vrot.lane.b32.xlu1 %v527_v38, %s2771_s27  ;;  %v612_v44 = vrot.slane %v527_v38, 1 }
 0x17e   :  { %v563_v26 = vrot.slane %v3223_v41, 7  ;;  %v611_v11 = vrot.slane %v3223_v41, 1  ;;  %656 = vrot.lane.b32.xlu0 %v3223_v41, %s2771_s27 }
 0x17f   :  { %v633_v14 = vsel %vm131_vm0, %v612_v44, 0.0 }
 0x180   :  { %v2604_v47 = vpop.f32.mrb[12].mxu0  ;;  %v613_v48 = vsel %vm131_vm0, %v611_v11, %v612_v44  ;;  %v3235_v52 = vsel %vm82_vm2, %v563_v26, %v564_v43  ;;  %v593_v54 = vsel %vm82_vm2, 0.0, %v563_v26 }
 0x181   :  { %v503_v53 = vadd.f32 %v2604_v47, %v3129_v63  ;;  %714 = vrot.lane.b32.xlu1 %v633_v14, %s2773_s2  ;;  %v497_v55 = vpop.f32.mrb[13].mxu0 }
 0x182   :  { %v498_v16 = vadd.f32 %v3129_v63, %v497_v55  ;;  %712 = vrot.lane.b32.xlu0 %v613_v48, %s2773_s2 }
 0x183   :  { %v529_v20 = vmax.f32 %v503_v53, 0.0 }
 0x184   :  { %v3241_v56 = vmax.f32 %v498_v16, 0.0 }
 0x185   :  { %v567_v59 = vrot.slane %v529_v20, 7  ;;  %662 = vrot.lane.b32.xlu1 %v529_v20, %s2771_s27  ;;  %v615_v61 = vrot.slane %v529_v20, 1 }
 0x186   :  { %v566_v62 = vrot.slane %v3241_v56, 7  ;;  %v614_v30 = vrot.slane %v3241_v56, 1  ;;  %660 = vrot.lane.b32.xlu0 %v3241_v56, %s2771_s27 }
 0x187   :  { %v634_v31 = vsel %vm131_vm0, %v615_v61, 0.0 }
 0x188   :  { %v2607_v33 = vpop.f32.mrb[14].mxu0  ;;  %v616_v3 = vsel %vm131_vm0, %v614_v30, %v615_v61  ;;  %v3253_v4 = vsel %vm82_vm2, %v566_v62, %v567_v59  ;;  %v594_v41 = vsel %vm82_vm2, 0.0, %v566_v62 }
 0x189   :  { %v513_v6 = vadd.f32 %v2607_v33, %v3129_v63  ;;  %718 = vrot.lane.b32.xlu1 %v634_v31, %s2773_s2  ;;  %v507_v7 = vpop.f32.mrb[15].mxu0 }
 0x18a   :  { %v508_v8 = vadd.f32 %v3129_v63, %v507_v7  ;;  %716 = vrot.lane.b32.xlu0 %v616_v3, %s2773_s2 }
 0x18b   :  { %v531_v40 = vmax.f32 %v513_v6, 0.0 }
 0x18c   :  { %v3259_v42 = vmax.f32 %v508_v8, 0.0 }
 0x18d   :  { %v570_v9 = vrot.slane %v531_v40, 7  ;;  %666 = vrot.lane.b32.xlu1 %v531_v40, %s2771_s27  ;;  %v618_v13 = vrot.slane %v531_v40, 1 }
 0x18e   :  { %v569_v15 = vrot.slane %v3259_v42, 7  ;;  %v617_v45 = vrot.slane %v3259_v42, 1  ;;  %664 = vrot.lane.b32.xlu0 %v3259_v42, %s2771_s27  ;;  %v1318_v42 = vld [vmem:[%s3965_s5] sm:$0xff] }
 0x18f   :  { %v635_v18 = vsel %vm131_vm0, %v618_v13, 0.0 }
 0x190   :  { %v619_v63 = vsel %vm131_vm0, %v617_v45, %v618_v13  ;;  %v3271_v49 = vsel %vm82_vm2, %v569_v15, %v570_v9  ;;  %v595_v56 = vsel %vm82_vm2, 0.0, %v569_v15  ;;  %v1319_v15 = vld [vmem:[%s3965_s5 + $0x8] sm:$0xff] }
 0x191   :  { %722 = vrot.lane.b32.xlu1 %v635_v18, %s2773_s2 }
 0x192   :  { %720 = vrot.lane.b32.xlu0 %v619_v63, %s2773_s2 }
 0x1c7   :  { %v639_v51 = vpop.permute.xlu1 %638 }
 0x1c8   :  { %v637_v21 = vpop.permute.xlu0 %636  ;;  %v741_v58 = vsel %vm293_vm4, %v3145_v46, %v639_v51 }
 0x1c9   :  { %v740_v0 = vsel %vm293_vm4, %v588_v23, %v637_v21 }
 0x1cb   :  { %v695_v24 = vpop.permute.xlu1 %694 }
 0x1cc   :  { %v693_v22 = vpop.permute.xlu0 %692  ;;  %v758_v27 = vsel %vm756_vm9, %v741_v58, %v695_v24 }
 0x1cd   :  { %v757_v25 = vsel %vm756_vm9, %v740_v0, %v693_v22 }
 0x1ce   :  { %2612 = vmatprep.mubr.msk.f32.mxu1 %vm782_vm10, %v757_v25 }
 0x1cf   :  { %v643_v32 = vpop.permute.xlu1 %642  ;;  %2613 = vmatmul.mubr.msk.f32.vlgmr.msra.gmra.mrb[0].mxu1 %vm782_vm10, %v758_v27 }
 0x1d0   :  { %v641_v5 = vpop.permute.xlu0 %640  ;;  %v743_v46 = vsel %vm293_vm4, %v3163_v57, %v643_v32 }
 0x1d1   :  { %v742_v28 = vsel %vm293_vm4, %v589_v39, %v641_v5  ;;  %v2733_v39 = vpack.c.bf16 %v1319_v15, %v1318_v42 }
 0x1d3   :  { %v699_v34 = vpop.permute.xlu1 %698  ;;  %2734 = vmatprep.subr.bf16.mxu0 %v2733_v39 }
 0x1d4   :  { %v697_v37 = vpop.permute.xlu0 %696  ;;  %v760_v38 = vsel %vm756_vm9, %v743_v46, %v699_v34  ;;  %2736 = vmatpush3.bf16.msra.mxu0 %v2733_v39  ;;  %v3367_v34 = vld [vmem:[%s3966_s4] ss:$0 sm:$0xff]  ;;  %s2774_s4 = smov 16  }
 0x1d5   :  { %v759_v12 = vsel %vm756_vm9, %v742_v28, %v697_v37 }
 0x1d6   :  { %2615 = vmatprep.mubr.msk.f32.mxu1 %vm782_vm10, %v759_v12 }
 0x1d7   :  { %v647_v43 = vpop.permute.xlu1 %646  ;;  %2616 = vmatmul.mubr.msk.f32.gmra.mrb[2].mxu1 %vm782_vm10, %v760_v38 }
 0x1d8   :  { %v645_v44 = vpop.permute.xlu0 %644  ;;  %v745_v57 = vsel %vm293_vm4, %v3181_v36, %v647_v43 }
 0x1d9   :  { %v744_v11 = vsel %vm293_vm4, %v590_v50, %v645_v44 }
 0x1db   :  { %v703_v29 = vpop.permute.xlu1 %702 }
 0x1dc   :  { %v701_v14 = vpop.permute.xlu0 %700  ;;  %v762_v48 = vsel %vm756_vm9, %v745_v57, %v703_v29 }
 0x1dd   :  { %v761_v47 = vsel %vm756_vm9, %v744_v11, %v701_v14 }
 0x1de   :  { %2618 = vmatprep.mubr.msk.f32.mxu1 %vm782_vm10, %v761_v47 }
 0x1df   :  { %v651_v53 = vpop.permute.xlu1 %650  ;;  %2619 = vmatmul.mubr.msk.f32.gmra.mrb[4].mxu1 %vm782_vm10, %v762_v48 }
 0x1e0   :  { %v649_v55 = vpop.permute.xlu0 %648  ;;  %v747_v36 = vsel %vm293_vm4, %v3199_v19, %v651_v53 }
 0x1e1   :  { %v746_v16 = vsel %vm293_vm4, %v591_v1, %v649_v55 }
 0x1e3   :  { %v707_v2 = vpop.permute.xlu1 %706 }
 0x1e4   :  { %v705_v20 = vpop.permute.xlu0 %704  ;;  %v764_v61 = vsel %vm756_vm9, %v747_v36, %v707_v2 }
 0x1e5   :  { %v763_v59 = vsel %vm756_vm9, %v746_v16, %v705_v20 }
 0x1e6   :  { %2621 = vmatprep.mubr.msk.f32.mxu1 %vm782_vm10, %v763_v59 }
 0x1e7   :  { %v655_v30 = vpop.permute.xlu1 %654  ;;  %2622 = vmatmul.mubr.msk.f32.gmra.mrb[6].mxu1 %vm782_vm10, %v764_v61 }
 0x1e8   :  { %v653_v31 = vpop.permute.xlu0 %652  ;;  %v749_v19 = vsel %vm293_vm4, %v3217_v35, %v655_v30 }
 0x1e9   :  { %v748_v33 = vsel %vm293_vm4, %v592_v10, %v653_v31 }
 0x1eb   :  { %v711_v17 = vpop.permute.xlu1 %710 }
 0x1ec   :  { %v709_v3 = vpop.permute.xlu0 %708  ;;  %v766_v7 = vsel %vm756_vm9, %v749_v19, %v711_v17 }
 0x1ed   :  { %v765_v6 = vsel %vm756_vm9, %v748_v33, %v709_v3 }
 0x1ee   :  { %2624 = vmatprep.mubr.msk.f32.mxu1 %vm782_vm10, %v765_v6 }
 0x1ef   :  { %v659_v8 = vpop.permute.xlu1 %658  ;;  %2625 = vmatmul.mubr.msk.f32.gmra.mrb[8].mxu1 %vm782_vm10, %v766_v7 }
 0x1f0   :  { %v657_v40 = vpop.permute.xlu0 %656  ;;  %v751_v35 = vsel %vm293_vm4, %v3235_v52, %v659_v8 }
 0x1f1   :  { %v750_v9 = vsel %vm293_vm4, %v593_v54, %v657_v40 }
 0x1f3   :  { %v715_v60 = vpop.permute.xlu1 %714 }
 0x1f4   :  { %v713_v13 = vpop.permute.xlu0 %712  ;;  %v768_v18 = vsel %vm756_vm9, %v751_v35, %v715_v60 }
 0x1f5   :  { %v767_v45 = vsel %vm756_vm9, %v750_v9, %v713_v13 }
 0x1f6   :  { %2627 = vmatprep.mubr.msk.f32.mxu1 %vm782_vm10, %v767_v45 }
 0x1f7   :  { %v663_v63 = vpop.permute.xlu1 %662  ;;  %2628 = vmatmul.mubr.msk.f32.gmra.mrb[10].mxu1 %vm782_vm10, %v768_v18 }
 0x1f8   :  { %v661_v51 = vpop.permute.xlu0 %660  ;;  %v753_v52 = vsel %vm293_vm4, %v3253_v4, %v663_v63 }
 0x1f9   :  { %v752_v21 = vsel %vm293_vm4, %v594_v41, %v661_v51 }
 0x1fb   :  { %v719_v26 = vpop.permute.xlu1 %718 }
 0x1fc   :  { %v717_v23 = vpop.permute.xlu0 %716  ;;  %v770_v0 = vsel %vm756_vm9, %v753_v52, %v719_v26 }
 0x1fd   :  { %v769_v24 = vsel %vm756_vm9, %v752_v21, %v717_v23 }
 0x1fe   :  { %2630 = vmatprep.mubr.msk.f32.mxu1 %vm782_vm10, %v769_v24 }
 0x1ff   :  { %v667_v22 = vpop.permute.xlu1 %666  ;;  %2631 = vmatmul.mubr.msk.f32.gmra.mrb[12].mxu1 %vm782_vm10, %v770_v0 }
 0x200   :  { %v665_v58 = vpop.permute.xlu0 %664  ;;  %v755_v4 = vsel %vm293_vm4, %v3271_v49, %v667_v22  ;;  %v1320_v49 = vld [vmem:[%s3965_s5 + $0x10] sm:$0xff] }
 0x201   :  { %v754_v25 = vsel %vm293_vm4, %v595_v56, %v665_v58  ;;  %2640 = vmatprep.subr.mxu0 %v1320_v49  ;;  %vm2130_vm4 = vcmask 1042434  }
 0x202   :  { %2641 = vmatpush3.msra.mxu0 %v1320_v49 }
 0x203   :  { %v723_v62 = vpop.permute.xlu1 %722 }
 0x204   :  { %v721_v27 = vpop.permute.xlu0 %720  ;;  %v772_v5 = vsel %vm756_vm9, %v755_v4, %v723_v62 }
 0x205   :  { %v771_v32 = vsel %vm756_vm9, %v754_v25, %v721_v27 }
 0x206   :  { %2633 = vmatprep.mubr.msk.f32.mxu1 %vm782_vm10, %v771_v32 }
 0x207   :  { %2634 = vmatmul.mubr.msk.f32.gmra.mrb[14].mxu1 %vm782_vm10, %v772_v5  ;;  %vm2140_vm10 = vcmask 1047559  }
 0x2a2   :  { %v2614_v28 = vpop.f32.mrb[0].mxu1 }
 0x2a3   :  { %v907_v37 = vadd.f32 %v2614_v28, %v3367_v34  ;;  %v901_v46 = vpop.f32.mrb[1].mxu1 }
 0x2a4   :  { %v902_v12 = vadd.f32 %v3367_v34, %v901_v46 }
 0x2a5   :  { %v981_v38 = vmax.f32 %v907_v37, 0.0 }
 0x2a6   :  { %v980_v43 = vmax.f32 %v902_v12, 0.0 }
 0x2a7   :  { %v1013_v44 = vrot.slane %v981_v38, 1 }
 0x2a8   :  { %v1012_v50 = vrot.slane %v980_v43, 1 }
 0x2a9   :  { %v1052_v29 = vsel %vm131_vm0, %v1013_v44, 0.0 }
 0x2aa   :  { %v1061_v11 = vmax.f32 %v981_v38, %v1052_v29  ;;  %v1014_v14 = vsel %vm131_vm0, %v1012_v50, %v1013_v44  ;;  %v2617_v57 = vpop.f32.mrb[2].mxu1 }
 0x2ab   :  { %v3373_v47 = vmax.f32 %v980_v43, %v1014_v14  ;;  %v917_v48 = vadd.f32 %v2617_v57, %v3367_v34  ;;  %v911_v53 = vpop.f32.mrb[3].mxu1 }
 0x2ac   :  { %v1094_v55 = vrot.slane %v1061_v11, 6  ;;  %v912_v1 = vadd.f32 %v3367_v34, %v911_v53  ;;  %1183 = vrot.lane.b32.xlu1 %v1061_v11, %s2773_s2  ;;  %v1142_v2 = vrot.slane %v1061_v11, 2 }
 0x2ad   :  { %v1093_v16 = vrot.slane %v3373_v47, 6  ;;  %v983_v20 = vmax.f32 %v917_v48, 0.0  ;;  %1181 = vrot.lane.b32.xlu0 %v3373_v47, %s2773_s2  ;;  %v1141_v36 = vrot.slane %v3373_v47, 2 }
 0x2ae   :  { %v982_v59 = vmax.f32 %v912_v1, 0.0  ;;  %v1173_v61 = vsel %vm367_vm1, %v1142_v2, 0.0 }
 0x2af   :  { %v1016_v30 = vrot.slane %v983_v20, 1  ;;  %v1143_v31 = vsel %vm367_vm1, %v1141_v36, %v1142_v2  ;;  %v3387_v10 = vsel %vm1092_vm11, %v1093_v16, %v1094_v55 }
 0x2b0   :  { %v1015_v17 = vrot.slane %v982_v59, 1  ;;  %1239 = vrot.lane.b32.xlu1 %v1173_v61, %s2774_s4 }
 0x2b1   :  { %v1053_v33 = vsel %vm131_vm0, %v1016_v30, 0.0  ;;  %1237 = vrot.lane.b32.xlu0 %v1143_v31, %s2774_s4 }
 0x2b2   :  { %v1063_v3 = vmax.f32 %v983_v20, %v1053_v33  ;;  %v1017_v19 = vsel %vm131_vm0, %v1015_v17, %v1016_v30  ;;  %v2620_v6 = vpop.f32.mrb[4].mxu1 }
 0x2b3   :  { %v3393_v7 = vmax.f32 %v982_v59, %v1017_v19  ;;  %v927_v8 = vadd.f32 %v2620_v6, %v3367_v34  ;;  %v921_v40 = vpop.f32.mrb[5].mxu1 }
 0x2b4   :  { %v1097_v54 = vrot.slane %v1063_v3, 6  ;;  %v922_v60 = vadd.f32 %v3367_v34, %v921_v40  ;;  %1187 = vrot.lane.b32.xlu1 %v1063_v3, %s2773_s2  ;;  %v1145_v9 = vrot.slane %v1063_v3, 2 }
 0x2b5   :  { %v1096_v13 = vrot.slane %v3393_v7, 6  ;;  %v985_v35 = vmax.f32 %v927_v8, 0.0  ;;  %1185 = vrot.lane.b32.xlu0 %v3393_v7, %s2773_s2  ;;  %v1144_v45 = vrot.slane %v3393_v7, 2 }
 0x2b6   :  { %v984_v18 = vmax.f32 %v922_v60, 0.0  ;;  %v1174_v63 = vsel %vm367_vm1, %v1145_v9, 0.0 }
 0x2b7   :  { %v1019_v51 = vrot.slane %v985_v35, 1  ;;  %v1146_v41 = vsel %vm367_vm1, %v1144_v45, %v1145_v9  ;;  %v3407_v26 = vsel %vm1092_vm11, %v1096_v13, %v1097_v54 }
 0x2b8   :  { %v1018_v21 = vrot.slane %v984_v18, 1  ;;  %1243 = vrot.lane.b32.xlu1 %v1174_v63, %s2774_s4 }
 0x2b9   :  { %v1054_v23 = vsel %vm131_vm0, %v1019_v51, 0.0  ;;  %1241 = vrot.lane.b32.xlu0 %v1146_v41, %s2774_s4 }
 0x2ba   :  { %v1065_v52 = vmax.f32 %v985_v35, %v1054_v23  ;;  %v1020_v24 = vsel %vm131_vm0, %v1018_v21, %v1019_v51  ;;  %v2623_v0 = vpop.f32.mrb[6].mxu1 }
 0x2bb   :  { %v3413_v22 = vmax.f32 %v984_v18, %v1020_v24  ;;  %v937_v58 = vadd.f32 %v2623_v0, %v3367_v34  ;;  %v931_v56 = vpop.f32.mrb[7].mxu1 }
 0x2bc   :  { %v1100_v62 = vrot.slane %v1065_v52, 6  ;;  %v932_v25 = vadd.f32 %v3367_v34, %v931_v56  ;;  %1191 = vrot.lane.b32.xlu1 %v1065_v52, %s2773_s2  ;;  %v1148_v27 = vrot.slane %v1065_v52, 2 }
 0x2bd   :  { %v1099_v4 = vrot.slane %v3413_v22, 6  ;;  %v987_v32 = vmax.f32 %v937_v58, 0.0  ;;  %1189 = vrot.lane.b32.xlu0 %v3413_v22, %s2773_s2  ;;  %v1147_v5 = vrot.slane %v3413_v22, 2 }
 0x2be   :  { %v986_v42 = vmax.f32 %v932_v25, 0.0  ;;  %v1175_v15 = vsel %vm367_vm1, %v1148_v27, 0.0 }
 0x2bf   :  { %v1022_v39 = vrot.slane %v987_v32, 1  ;;  %v1149_v49 = vsel %vm367_vm1, %v1147_v5, %v1148_v27  ;;  %v3427_v28 = vsel %vm1092_vm11, %v1099_v4, %v1100_v62  ;;  %v1135_v7 = vsel %vm1092_vm11, 0.0, %v1099_v4 }
 0x2c0   :  { %v1021_v37 = vrot.slane %v986_v42, 1  ;;  %1247 = vrot.lane.b32.xlu1 %v1175_v15, %s2774_s4 }
 0x2c1   :  { %v1055_v46 = vsel %vm131_vm0, %v1022_v39, 0.0  ;;  %1245 = vrot.lane.b32.xlu0 %v1149_v49, %s2774_s4 }
 0x2c2   :  { %v1067_v12 = vmax.f32 %v987_v32, %v1055_v46  ;;  %v1023_v38 = vsel %vm131_vm0, %v1021_v37, %v1022_v39  ;;  %v2626_v43 = vpop.f32.mrb[8].mxu1 }
 0x2c3   :  { %v3433_v44 = vmax.f32 %v986_v42, %v1023_v38  ;;  %v947_v50 = vadd.f32 %v2626_v43, %v3367_v34  ;;  %v941_v29 = vpop.f32.mrb[9].mxu1 }
 0x2c4   :  { %v1103_v11 = vrot.slane %v1067_v12, 6  ;;  %v942_v14 = vadd.f32 %v3367_v34, %v941_v29  ;;  %1195 = vrot.lane.b32.xlu1 %v1067_v12, %s2773_s2  ;;  %v1151_v57 = vrot.slane %v1067_v12, 2 }
 0x2c5   :  { %v1102_v48 = vrot.slane %v3433_v44, 6  ;;  %v989_v53 = vmax.f32 %v947_v50, 0.0  ;;  %1193 = vrot.lane.b32.xlu0 %v3433_v44, %s2773_s2  ;;  %v1150_v55 = vrot.slane %v3433_v44, 2 }
 0x2c6   :  { %v988_v1 = vmax.f32 %v942_v14, 0.0  ;;  %v1176_v2 = vsel %vm367_vm1, %v1151_v57, 0.0 }
 0x2c7   :  { %v1025_v20 = vrot.slane %v989_v53, 1  ;;  %v1152_v36 = vsel %vm367_vm1, %v1150_v55, %v1151_v57  ;;  %v3447_v59 = vsel %vm1092_vm11, %v1102_v48, %v1103_v11  ;;  %v1136_v22 = vsel %vm1092_vm11, 0.0, %v1102_v48 }
 0x2c8   :  { %v1024_v61 = vrot.slane %v988_v1, 1  ;;  %1251 = vrot.lane.b32.xlu1 %v1176_v2, %s2774_s4 }
 0x2c9   :  { %v1056_v30 = vsel %vm131_vm0, %v1025_v20, 0.0  ;;  %1249 = vrot.lane.b32.xlu0 %v1152_v36, %s2774_s4 }
 0x2ca   :  { %v1069_v31 = vmax.f32 %v989_v53, %v1056_v30  ;;  %v1026_v17 = vsel %vm131_vm0, %v1024_v61, %v1025_v20  ;;  %v2629_v33 = vpop.f32.mrb[10].mxu1 }
 0x2cb   :  { %v3453_v3 = vmax.f32 %v988_v1, %v1026_v17  ;;  %v957_v19 = vadd.f32 %v2629_v33, %v3367_v34  ;;  %v951_v6 = vpop.f32.mrb[11].mxu1 }
 0x2cc   :  { %v1106_v8 = vrot.slane %v1069_v31, 6  ;;  %v952_v40 = vadd.f32 %v3367_v34, %v951_v6  ;;  %1199 = vrot.lane.b32.xlu1 %v1069_v31, %s2773_s2  ;;  %v1154_v54 = vrot.slane %v1069_v31, 2 }
 0x2cd   :  { %v1105_v60 = vrot.slane %v3453_v3, 6  ;;  %v991_v9 = vmax.f32 %v957_v19, 0.0  ;;  %1197 = vrot.lane.b32.xlu0 %v3453_v3, %s2773_s2  ;;  %v1153_v35 = vrot.slane %v3453_v3, 2 }
 0x2ce   :  { %v990_v45 = vmax.f32 %v952_v40, 0.0  ;;  %v1177_v18 = vsel %vm367_vm1, %v1154_v54, 0.0 }
 0x2cf   :  { %v1028_v63 = vrot.slane %v991_v9, 1  ;;  %v1155_v51 = vsel %vm367_vm1, %v1153_v35, %v1154_v54  ;;  %v3467_v41 = vsel %vm1092_vm11, %v1105_v60, %v1106_v8  ;;  %v1137_v44 = vsel %vm1092_vm11, 0.0, %v1105_v60 }
 0x2d0   :  { %v1027_v21 = vrot.slane %v990_v45, 1  ;;  %1255 = vrot.lane.b32.xlu1 %v1177_v18, %s2774_s4 }
 0x2d1   :  { %v1057_v23 = vsel %vm131_vm0, %v1028_v63, 0.0  ;;  %1253 = vrot.lane.b32.xlu0 %v1155_v51, %s2774_s4 }
 0x2d2   :  { %v1071_v52 = vmax.f32 %v991_v9, %v1057_v23  ;;  %v1029_v24 = vsel %vm131_vm0, %v1027_v21, %v1028_v63  ;;  %v2632_v0 = vpop.f32.mrb[12].mxu1 }
 0x2d3   :  { %v3473_v58 = vmax.f32 %v990_v45, %v1029_v24  ;;  %v967_v56 = vadd.f32 %v2632_v0, %v3367_v34  ;;  %v961_v62 = vpop.f32.mrb[13].mxu1  ;;  %v1133_v24 = vsel %vm1092_vm11, 0.0, %v1093_v16  ;;  %v1134_v16 = vsel %vm1092_vm11, 0.0, %v1096_v13 }
 0x2d4   :  { %v1109_v25 = vrot.slane %v1071_v52, 6  ;;  %v962_v27 = vadd.f32 %v3367_v34, %v961_v62  ;;  %1203 = vrot.lane.b32.xlu1 %v1071_v52, %s2773_s2  ;;  %v1157_v32 = vrot.slane %v1071_v52, 2 }
 0x2d5   :  { %v1108_v5 = vrot.slane %v3473_v58, 6  ;;  %v993_v42 = vmax.f32 %v967_v56, 0.0  ;;  %1201 = vrot.lane.b32.xlu0 %v3473_v58, %s2773_s2  ;;  %v1156_v15 = vrot.slane %v3473_v58, 2 }
 0x2d6   :  { %v992_v39 = vmax.f32 %v962_v27, 0.0  ;;  %v1178_v49 = vsel %vm367_vm1, %v1157_v32, 0.0 }
 0x2d7   :  { %v1031_v37 = vrot.slane %v993_v42, 1  ;;  %v1158_v46 = vsel %vm367_vm1, %v1156_v15, %v1157_v32  ;;  %v3487_v12 = vsel %vm1092_vm11, %v1108_v5, %v1109_v25  ;;  %v1138_v3 = vsel %vm1092_vm11, 0.0, %v1108_v5 }
 0x2d8   :  { %v1030_v38 = vrot.slane %v992_v39, 1  ;;  %1259 = vrot.lane.b32.xlu1 %v1178_v49, %s2774_s4 }
 0x2d9   :  { %v1058_v43 = vsel %vm131_vm0, %v1031_v37, 0.0  ;;  %1257 = vrot.lane.b32.xlu0 %v1158_v46, %s2774_s4 }
 0x2da   :  { %v1073_v50 = vmax.f32 %v993_v42, %v1058_v43  ;;  %v1032_v29 = vsel %vm131_vm0, %v1030_v38, %v1031_v37  ;;  %v2635_v11 = vpop.f32.mrb[14].mxu1 }
 0x2db   :  { %v3493_v14 = vmax.f32 %v992_v39, %v1032_v29  ;;  %v977_v57 = vadd.f32 %v2635_v11, %v3367_v34  ;;  %v971_v53 = vpop.f32.mrb[15].mxu1 }
 0x2dc   :  { %v1112_v55 = vrot.slane %v1073_v50, 6  ;;  %v972_v1 = vadd.f32 %v3367_v34, %v971_v53  ;;  %1207 = vrot.lane.b32.xlu1 %v1073_v50, %s2773_s2  ;;  %v1160_v2 = vrot.slane %v1073_v50, 2 }
 0x2dd   :  { %v1111_v20 = vrot.slane %v3493_v14, 6  ;;  %v995_v36 = vmax.f32 %v977_v57, 0.0  ;;  %1205 = vrot.lane.b32.xlu0 %v3493_v14, %s2773_s2  ;;  %v1159_v61 = vrot.slane %v3493_v14, 2 }
 0x2de   :  { %v994_v30 = vmax.f32 %v972_v1, 0.0  ;;  %v1179_v31 = vsel %vm367_vm1, %v1160_v2, 0.0 }
 0x2df   :  { %v1034_v17 = vrot.slane %v995_v36, 1  ;;  %v1161_v33 = vsel %vm367_vm1, %v1159_v61, %v1160_v2  ;;  %v3507_v34 = vsel %vm1092_vm11, %v1111_v20, %v1112_v55  ;;  %v1139_v58 = vsel %vm1092_vm11, 0.0, %v1111_v20 }
 0x2e0   :  { %v1033_v19 = vrot.slane %v994_v30, 1  ;;  %1263 = vrot.lane.b32.xlu1 %v1179_v31, %s2774_s4 }
 0x2e1   :  { %v1059_v6 = vsel %vm131_vm0, %v1034_v17, 0.0  ;;  %1261 = vrot.lane.b32.xlu0 %v1161_v33, %s2774_s4 }
 0x2e2   :  { %v1075_v8 = vmax.f32 %v995_v36, %v1059_v6  ;;  %v1035_v40 = vsel %vm131_vm0, %v1033_v19, %v1034_v17  ;;  %vm2777_vm0 = vmmov 0  }
 0x2e3   :  { %v3513_v54 = vmax.f32 %v994_v30, %v1035_v40 }
 0x2e4   :  { %v1115_v9 = vrot.slane %v1075_v8, 6  ;;  %1211 = vrot.lane.b32.xlu1 %v1075_v8, %s2773_s2  ;;  %v1163_v35 = vrot.slane %v1075_v8, 2 }
 0x2e5   :  { %v1114_v45 = vrot.slane %v3513_v54, 6  ;;  %1209 = vrot.lane.b32.xlu0 %v3513_v54, %s2773_s2  ;;  %v1162_v18 = vrot.slane %v3513_v54, 2  ;;  %v1779_v54 = vld [vmem:[%s3967_s7] sm:$0xff] }
 0x2e6   :  { %v1180_v63 = vsel %vm367_vm1, %v1163_v35, 0.0 }
 0x2e7   :  { %v1164_v51 = vsel %vm367_vm1, %v1162_v18, %v1163_v35  ;;  %v3525_v21 = vsel %vm1092_vm11, %v1114_v45, %v1115_v9  ;;  %v1140_v14 = vsel %vm1092_vm11, 0.0, %v1114_v45  ;;  %v1780_v45 = vld [vmem:[%s3967_s7 + $0x8] sm:$0xff] }
 0x2e8   :  { %1267 = vrot.lane.b32.xlu1 %v1180_v63, %s2774_s4 }
 0x2e9   :  { %1265 = vrot.lane.b32.xlu0 %v1164_v51, %s2774_s4 }
 0x31e   :  { %v1184_v23 = vpop.permute.xlu1 %1183 }
 0x31f   :  { %v1182_v52 = vpop.permute.xlu0 %1181  ;;  %v1286_v25 = vsel %vm756_vm9, %v3387_v10, %v1184_v23 }
 0x320   :  { %v1285_v56 = vsel %vm756_vm9, %v1133_v24, %v1182_v52 }
 0x322   :  { %v1240_v0 = vpop.permute.xlu1 %1239 }
 0x323   :  { %v1238_v62 = vpop.permute.xlu0 %1237  ;;  %v1303_v32 = vsel %vm1301_vm12, %v1286_v25, %v1240_v0 }
 0x324   :  { %v1302_v27 = vsel %vm1301_vm12, %v1285_v56, %v1238_v62 }
 0x325   :  { %2642 = vmatprep.mubr.msk.f32.mxu0 %vm1328_vm13, %v1302_v27 }
 0x326   :  { %v1188_v42 = vpop.permute.xlu1 %1187  ;;  %2643 = vmatmul.mubr.msk.f32.vlgmr.msra.gmra.mrb[16].mxu0 %vm1328_vm13, %v1303_v32 }
 0x327   :  { %v1186_v47 = vpop.permute.xlu0 %1185  ;;  %v1288_v10 = vsel %vm756_vm9, %v3407_v26, %v1188_v42 }
 0x328   :  { %v1287_v39 = vsel %vm756_vm9, %v1134_v16, %v1186_v47  ;;  %v2737_v16 = vpack.c.bf16 %v1780_v45, %v1779_v54 }
 0x32a   :  { %v1244_v15 = vpop.permute.xlu1 %1243  ;;  %2738 = vmatprep.subr.bf16.mxu1 %v2737_v16 }
 0x32b   :  { %v1242_v49 = vpop.permute.xlu0 %1241  ;;  %v1305_v46 = vsel %vm1301_vm12, %v1288_v10, %v1244_v15  ;;  %v1782_v15 = vld [vmem:[%s3967_s7 + $0x18] sm:$0xff]  ;;  %2740 = vmatpush3.bf16.msra.mxu1 %v2737_v16  ;;  %v1784_v10 = vld [vmem:[%s3967_s7 + $0x28] sm:$0xff] }
 0x32c   :  { %v1304_v37 = vsel %vm1301_vm12, %v1287_v39, %v1242_v49  ;;  %v1783_v49 = vld [vmem:[%s3967_s7 + $0x20] sm:$0xff] }
 0x32d   :  { %2645 = vmatprep.mubr.msk.f32.mxu0 %vm1328_vm13, %v1304_v37  ;;  %v2745_v37 = vpack.c.bf16 %v1784_v10, %v1783_v49 }
 0x32e   :  { %v1192_v38 = vpop.permute.xlu1 %1191  ;;  %2646 = vmatmul.mubr.msk.f32.gmra.mrb[18].mxu0 %vm1328_vm13, %v1305_v46  ;;  %v3630_v46 = vld [vmem:[%s3968_s6] ss:$0 sm:$0xff]  ;;  %s2775_s6 = smov 32  }
 0x32f   :  { %v1190_v43 = vpop.permute.xlu0 %1189  ;;  %v1290_v26 = vsel %vm756_vm9, %v3427_v28, %v1192_v38 }
 0x330   :  { %v1289_v50 = vsel %vm756_vm9, %v1135_v7, %v1190_v43 }
 0x332   :  { %v1248_v13 = vpop.permute.xlu1 %1247 }
 0x333   :  { %v1246_v29 = vpop.permute.xlu0 %1245  ;;  %v1307_v57 = vsel %vm1301_vm12, %v1290_v26, %v1248_v13 }
 0x334   :  { %v1306_v11 = vsel %vm1301_vm12, %v1289_v50, %v1246_v29 }
 0x335   :  { %2648 = vmatprep.mubr.msk.f32.mxu0 %vm1328_vm13, %v1306_v11 }
 0x336   :  { %v1196_v53 = vpop.permute.xlu1 %1195  ;;  %2649 = vmatmul.mubr.msk.f32.gmra.mrb[20].mxu0 %vm1328_vm13, %v1307_v57 }
 0x337   :  { %v1194_v55 = vpop.permute.xlu0 %1193  ;;  %v1292_v28 = vsel %vm756_vm9, %v3447_v59, %v1196_v53 }
 0x338   :  { %v1291_v1 = vsel %vm756_vm9, %v1136_v22, %v1194_v55 }
 0x33a   :  { %v1252_v4 = vpop.permute.xlu1 %1251 }
 0x33b   :  { %v1250_v2 = vpop.permute.xlu0 %1249  ;;  %v1309_v61 = vsel %vm1301_vm12, %v1292_v28, %v1252_v4 }
 0x33c   :  { %v1308_v36 = vsel %vm1301_vm12, %v1291_v1, %v1250_v2 }
 0x33d   :  { %2651 = vmatprep.mubr.msk.f32.mxu0 %vm1328_vm13, %v1308_v36 }
 0x33e   :  { %v1200_v30 = vpop.permute.xlu1 %1199  ;;  %2652 = vmatmul.mubr.msk.f32.gmra.mrb[22].mxu0 %vm1328_vm13, %v1309_v61 }
 0x33f   :  { %v1198_v31 = vpop.permute.xlu0 %1197  ;;  %v1294_v59 = vsel %vm756_vm9, %v3467_v41, %v1200_v30 }
 0x340   :  { %v1293_v17 = vsel %vm756_vm9, %v1137_v44, %v1198_v31 }
 0x342   :  { %v1256_v48 = vpop.permute.xlu1 %1255 }
 0x343   :  { %v1254_v33 = vpop.permute.xlu0 %1253  ;;  %v1311_v6 = vsel %vm1301_vm12, %v1294_v59, %v1256_v48 }
 0x344   :  { %v1310_v19 = vsel %vm1301_vm12, %v1293_v17, %v1254_v33 }
 0x345   :  { %2654 = vmatprep.mubr.msk.f32.mxu0 %vm1328_vm13, %v1310_v19 }
 0x346   :  { %v1204_v8 = vpop.permute.xlu1 %1203  ;;  %2655 = vmatmul.mubr.msk.f32.gmra.mrb[24].mxu0 %vm1328_vm13, %v1311_v6 }
 0x347   :  { %v1202_v40 = vpop.permute.xlu0 %1201  ;;  %v1296_v41 = vsel %vm756_vm9, %v3487_v12, %v1204_v8 }
 0x348   :  { %v1295_v9 = vsel %vm756_vm9, %v1138_v3, %v1202_v40 }
 0x34a   :  { %v1260_v60 = vpop.permute.xlu1 %1259 }
 0x34b   :  { %v1258_v35 = vpop.permute.xlu0 %1257  ;;  %v1313_v63 = vsel %vm1301_vm12, %v1296_v41, %v1260_v60 }
 0x34c   :  { %v1312_v18 = vsel %vm1301_vm12, %v1295_v9, %v1258_v35 }
 0x34d   :  { %2657 = vmatprep.mubr.msk.f32.mxu0 %vm1328_vm13, %v1312_v18 }
 0x34e   :  { %v1208_v51 = vpop.permute.xlu1 %1207  ;;  %2658 = vmatmul.mubr.msk.f32.gmra.mrb[26].mxu0 %vm1328_vm13, %v1313_v63 }
 0x34f   :  { %v1206_v23 = vpop.permute.xlu0 %1205  ;;  %v1298_v12 = vsel %vm756_vm9, %v3507_v34, %v1208_v51 }
 0x350   :  { %v1297_v52 = vsel %vm756_vm9, %v1139_v58, %v1206_v23 }
 0x352   :  { %v1264_v5 = vpop.permute.xlu1 %1263 }
 0x353   :  { %v1262_v24 = vpop.permute.xlu0 %1261  ;;  %v1315_v56 = vsel %vm1301_vm12, %v1298_v12, %v1264_v5 }
 0x354   :  { %v1314_v0 = vsel %vm1301_vm12, %v1297_v52, %v1262_v24 }
 0x355   :  { %2660 = vmatprep.mubr.msk.f32.mxu0 %vm1328_vm13, %v1314_v0 }
 0x356   :  { %v1212_v62 = vpop.permute.xlu1 %1211  ;;  %2661 = vmatmul.mubr.msk.f32.gmra.mrb[28].mxu0 %vm1328_vm13, %v1315_v56 }
 0x357   :  { %v1210_v25 = vpop.permute.xlu0 %1209  ;;  %v1300_v34 = vsel %vm756_vm9, %v3525_v21, %v1212_v62  ;;  %v1781_v21 = vld [vmem:[%s3967_s7 + $0x10] sm:$0xff] }
 0x358   :  { %v1299_v27 = vsel %vm756_vm9, %v1140_v14, %v1210_v25  ;;  %v2741_v39 = vpack.c.bf16 %v1782_v15, %v1781_v21 }
 0x35a   :  { %v1268_v20 = vpop.permute.xlu1 %1267  ;;  %2742 = vmatprep.subr.bf16.mxu1 %v2741_v39 }
 0x35b   :  { %v1266_v32 = vpop.permute.xlu0 %1265  ;;  %v1317_v47 = vsel %vm1301_vm12, %v1300_v34, %v1268_v20  ;;  %2744 = vmatpush3.bf16.msra.mxu1 %v2741_v39 }
 0x35c   :  { %v1316_v42 = vsel %vm1301_vm12, %v1299_v27, %v1266_v32  ;;  %2746 = vmatprep.subr.bf16.mxu1 %v2745_v37 }
 0x35d   :  { %2663 = vmatprep.mubr.msk.f32.mxu0 %vm1328_vm13, %v1316_v42 }
 0x35e   :  { %2664 = vmatmul.mubr.msk.f32.gmra.mrb[30].mxu0 %vm1328_vm13, %v1317_v47 }
 0x35f   :  { %2748 = vmatpush3.bf16.msra.mxu1 %v2745_v37 }
 0x3f9   :  { %v2644_v38 = vpop.f32.mrb[16].mxu0 }
 0x3fa   :  { %v1449_v43 = vadd.f32 %v2644_v38, %v3630_v46  ;;  %v1443_v7 = vpop.f32.mrb[17].mxu0 }
 0x3fb   :  { %v1444_v13 = vadd.f32 %v3630_v46, %v1443_v7 }
 0x3fc   :  { %v1523_v50 = vmax.f32 %v1449_v43, 0.0 }
 0x3fd   :  { %v3634_v29 = vmax.f32 %v1444_v13, 0.0 }
 0x3fe   :  { %v1555_v26 = vrot.slane %v1523_v50, 6  ;;  %1644 = vrot.lane.b32.xlu1 %v1523_v50, %s2774_s4  ;;  %v1603_v11 = vrot.slane %v1523_v50, 2 }
 0x3ff   :  { %v1554_v57 = vrot.slane %v3634_v29, 6  ;;  %v1602_v53 = vrot.slane %v3634_v29, 2  ;;  %1642 = vrot.lane.b32.xlu0 %v3634_v29, %s2774_s4 }
 0x400   :  { %v1634_v55 = vsel %vm367_vm1, %v1603_v11, 0.0 }
 0x401   :  { %v2647_v22 = vpop.f32.mrb[18].mxu0  ;;  %v1604_v4 = vsel %vm367_vm1, %v1602_v53, %v1603_v11  ;;  %v3646_v1 = vsel %vm1092_vm11, %v1554_v57, %v1555_v26 }
 0x402   :  { %v1459_v2 = vadd.f32 %v2647_v22, %v3630_v46  ;;  %1700 = vrot.lane.b32.xlu1 %v1634_v55, %s2775_s6  ;;  %v1453_v28 = vpop.f32.mrb[19].mxu0 }
 0x403   :  { %v1454_v36 = vadd.f32 %v3630_v46, %v1453_v28  ;;  %1698 = vrot.lane.b32.xlu0 %v1604_v4, %s2775_s6 }
 0x404   :  { %v1525_v61 = vmax.f32 %v1459_v2, 0.0 }
 0x405   :  { %v3652_v30 = vmax.f32 %v1454_v36, 0.0 }
 0x406   :  { %v1558_v31 = vrot.slane %v1525_v61, 6  ;;  %1648 = vrot.lane.b32.xlu1 %v1525_v61, %s2774_s4  ;;  %v1606_v44 = vrot.slane %v1525_v61, 2 }
 0x407   :  { %v1557_v48 = vrot.slane %v3652_v30, 6  ;;  %v1605_v17 = vrot.slane %v3652_v30, 2  ;;  %1646 = vrot.lane.b32.xlu0 %v3652_v30, %s2774_s4 }
 0x408   :  { %v1635_v33 = vsel %vm367_vm1, %v1606_v44, 0.0 }
 0x409   :  { %v2650_v59 = vpop.f32.mrb[20].mxu0  ;;  %v1607_v19 = vsel %vm367_vm1, %v1605_v17, %v1606_v44  ;;  %v3664_v6 = vsel %vm1092_vm11, %v1557_v48, %v1558_v31 }
 0x40a   :  { %v1469_v8 = vadd.f32 %v2650_v59, %v3630_v46  ;;  %1704 = vrot.lane.b32.xlu1 %v1635_v33, %s2775_s6  ;;  %v1463_v40 = vpop.f32.mrb[21].mxu0 }
 0x40b   :  { %v1464_v3 = vadd.f32 %v3630_v46, %v1463_v40  ;;  %1702 = vrot.lane.b32.xlu0 %v1607_v19, %s2775_s6 }
 0x40c   :  { %v1527_v60 = vmax.f32 %v1469_v8, 0.0 }
 0x40d   :  { %v3670_v9 = vmax.f32 %v1464_v3, 0.0 }
 0x40e   :  { %v1561_v35 = vrot.slane %v1527_v60, 6  ;;  %1652 = vrot.lane.b32.xlu1 %v1527_v60, %s2774_s4  ;;  %v1609_v41 = vrot.slane %v1527_v60, 2 }
 0x40f   :  { %v1560_v18 = vrot.slane %v3670_v9, 6  ;;  %v1608_v63 = vrot.slane %v3670_v9, 2  ;;  %1650 = vrot.lane.b32.xlu0 %v3670_v9, %s2774_s4 }
 0x410   :  { %v1636_v51 = vsel %vm367_vm1, %v1609_v41, 0.0 }
 0x411   :  { %v2653_v23 = vpop.f32.mrb[22].mxu0  ;;  %v1610_v58 = vsel %vm367_vm1, %v1608_v63, %v1609_v41  ;;  %v3682_v5 = vsel %vm1092_vm11, %v1560_v18, %v1561_v35  ;;  %v1596_v30 = vsel %vm1092_vm11, 0.0, %v1560_v18 }
 0x412   :  { %v1479_v52 = vadd.f32 %v2653_v23, %v3630_v46  ;;  %1708 = vrot.lane.b32.xlu1 %v1636_v51, %s2775_s6  ;;  %v1473_v24 = vpop.f32.mrb[23].mxu0 }
 0x413   :  { %v1474_v12 = vadd.f32 %v3630_v46, %v1473_v24  ;;  %1706 = vrot.lane.b32.xlu0 %v1610_v58, %s2775_s6 }
 0x414   :  { %v1529_v0 = vmax.f32 %v1479_v52, 0.0 }
 0x415   :  { %v3688_v56 = vmax.f32 %v1474_v12, 0.0 }
 0x416   :  { %v1564_v62 = vrot.slane %v1529_v0, 6  ;;  %1656 = vrot.lane.b32.xlu1 %v1529_v0, %s2774_s4  ;;  %v1612_v25 = vrot.slane %v1529_v0, 2 }
 0x417   :  { %v1563_v14 = vrot.slane %v3688_v56, 6  ;;  %v1611_v20 = vrot.slane %v3688_v56, 2  ;;  %1654 = vrot.lane.b32.xlu0 %v3688_v56, %s2774_s4 }
 0x418   :  { %v1637_v27 = vsel %vm367_vm1, %v1612_v25, 0.0 }
 0x419   :  { %v2656_v32 = vpop.f32.mrb[24].mxu0  ;;  %v1613_v34 = vsel %vm367_vm1, %v1611_v20, %v1612_v25  ;;  %v3700_v42 = vsel %vm1092_vm11, %v1563_v14, %v1564_v62  ;;  %v1597_v9 = vsel %vm1092_vm11, 0.0, %v1563_v14 }
 0x41a   :  { %v1489_v47 = vadd.f32 %v2656_v32, %v3630_v46  ;;  %1712 = vrot.lane.b32.xlu1 %v1637_v27, %s2775_s6  ;;  %v1483_v54 = vpop.f32.mrb[25].mxu0 }
 0x41b   :  { %v1484_v45 = vadd.f32 %v3630_v46, %v1483_v54  ;;  %1710 = vrot.lane.b32.xlu0 %v1613_v34, %s2775_s6  ;;  %v1594_v54 = vsel %vm1092_vm11, 0.0, %v1554_v57  ;;  %v1595_v57 = vsel %vm1092_vm11, 0.0, %v1557_v48 }
 0x41c   :  { %v1531_v21 = vmax.f32 %v1489_v47, 0.0 }
 0x41d   :  { %v3706_v16 = vmax.f32 %v1484_v45, 0.0 }
 0x41e   :  { %v1567_v15 = vrot.slane %v1531_v21, 6  ;;  %1660 = vrot.lane.b32.xlu1 %v1531_v21, %s2774_s4  ;;  %v1615_v39 = vrot.slane %v1531_v21, 2 }
 0x41f   :  { %v1566_v49 = vrot.slane %v3706_v16, 6  ;;  %v1614_v10 = vrot.slane %v3706_v16, 2  ;;  %1658 = vrot.lane.b32.xlu0 %v3706_v16, %s2774_s4 }
 0x420   :  { %v1638_v37 = vsel %vm367_vm1, %v1615_v39, 0.0 }
 0x421   :  { %v2659_v38 = vpop.f32.mrb[26].mxu0  ;;  %v1616_v43 = vsel %vm367_vm1, %v1614_v10, %v1615_v39  ;;  %v3718_v7 = vsel %vm1092_vm11, %v1566_v49, %v1567_v15  ;;  %v1598_v56 = vsel %vm1092_vm11, 0.0, %v1566_v49 }
 0x422   :  { %v1499_v13 = vadd.f32 %v2659_v38, %v3630_v46  ;;  %1716 = vrot.lane.b32.xlu1 %v1638_v37, %s2775_s6  ;;  %v1493_v50 = vpop.f32.mrb[27].mxu0 }
 0x423   :  { %v1494_v26 = vadd.f32 %v3630_v46, %v1493_v50  ;;  %1714 = vrot.lane.b32.xlu0 %v1616_v43, %s2775_s6 }
 0x424   :  { %v1533_v11 = vmax.f32 %v1499_v13, 0.0 }
 0x425   :  { %v3724_v53 = vmax.f32 %v1494_v26, 0.0 }
 0x426   :  { %v1570_v55 = vrot.slane %v1533_v11, 6  ;;  %1664 = vrot.lane.b32.xlu1 %v1533_v11, %s2774_s4  ;;  %v1618_v22 = vrot.slane %v1533_v11, 2 }
 0x427   :  { %v1569_v4 = vrot.slane %v3724_v53, 6  ;;  %v1617_v2 = vrot.slane %v3724_v53, 2  ;;  %1662 = vrot.lane.b32.xlu0 %v3724_v53, %s2774_s4 }
 0x428   :  { %v1639_v28 = vsel %vm367_vm1, %v1618_v22, 0.0 }
 0x429   :  { %v2662_v36 = vpop.f32.mrb[28].mxu0  ;;  %v1619_v61 = vsel %vm367_vm1, %v1617_v2, %v1618_v22  ;;  %v3736_v31 = vsel %vm1092_vm11, %v1569_v4, %v1570_v55  ;;  %v1599_v16 = vsel %vm1092_vm11, 0.0, %v1569_v4 }
 0x42a   :  { %v1509_v44 = vadd.f32 %v2662_v36, %v3630_v46  ;;  %1720 = vrot.lane.b32.xlu1 %v1639_v28, %s2775_s6  ;;  %v1503_v17 = vpop.f32.mrb[29].mxu0 }
 0x42b   :  { %v1504_v33 = vadd.f32 %v3630_v46, %v1503_v17  ;;  %1718 = vrot.lane.b32.xlu0 %v1619_v61, %s2775_s6 }
 0x42c   :  { %v1535_v59 = vmax.f32 %v1509_v44, 0.0 }
 0x42d   :  { %v3742_v19 = vmax.f32 %v1504_v33, 0.0 }
 0x42e   :  { %v1573_v8 = vrot.slane %v1535_v59, 6  ;;  %1668 = vrot.lane.b32.xlu1 %v1535_v59, %s2774_s4  ;;  %v1621_v40 = vrot.slane %v1535_v59, 2 }
 0x42f   :  { %v1572_v3 = vrot.slane %v3742_v19, 6  ;;  %v1620_v60 = vrot.slane %v3742_v19, 2  ;;  %1666 = vrot.lane.b32.xlu0 %v3742_v19, %s2774_s4 }
 0x430   :  { %v1640_v35 = vsel %vm367_vm1, %v1621_v40, 0.0 }
 0x431   :  { %v2665_v41 = vpop.f32.mrb[30].mxu0  ;;  %v1622_v63 = vsel %vm367_vm1, %v1620_v60, %v1621_v40  ;;  %v3754_v51 = vsel %vm1092_vm11, %v1572_v3, %v1573_v8  ;;  %v1600_v53 = vsel %vm1092_vm11, 0.0, %v1572_v3 }
 0x432   :  { %v1519_v23 = vadd.f32 %v2665_v41, %v3630_v46  ;;  %1724 = vrot.lane.b32.xlu1 %v1640_v35, %s2775_s6  ;;  %v1513_v58 = vpop.f32.mrb[31].mxu0 }
 0x433   :  { %v1514_v52 = vadd.f32 %v3630_v46, %v1513_v58  ;;  %1722 = vrot.lane.b32.xlu0 %v1622_v63, %s2775_s6 }
 0x434   :  { %v1537_v24 = vmax.f32 %v1519_v23, 0.0 }
 0x435   :  { %v3760_v12 = vmax.f32 %v1514_v52, 0.0 }
 0x436   :  { %v1576_v0 = vrot.slane %v1537_v24, 6  ;;  %1672 = vrot.lane.b32.xlu1 %v1537_v24, %s2774_s4  ;;  %v1624_v62 = vrot.slane %v1537_v24, 2 }
 0x437   :  { %v1575_v25 = vrot.slane %v3760_v12, 6  ;;  %v1623_v20 = vrot.slane %v3760_v12, 2  ;;  %1670 = vrot.lane.b32.xlu0 %v3760_v12, %s2774_s4  ;;  %v2109_v12 = vld [vmem:[%s3969_s9] sm:$0xff] }
 0x438   :  { %v1641_v27 = vsel %vm367_vm1, %v1624_v62, 0.0 }
 0x439   :  { %v1625_v46 = vsel %vm367_vm1, %v1623_v20, %v1624_v62  ;;  %v3772_v32 = vsel %vm1092_vm11, %v1575_v25, %v1576_v0  ;;  %v1601_v19 = vsel %vm1092_vm11, 0.0, %v1575_v25  ;;  %v2110_v25 = vld [vmem:[%s3969_s9 + $0x8] sm:$0xff] }
 0x43a   :  { %1728 = vrot.lane.b32.xlu1 %v1641_v27, %s2775_s6 }
 0x43b   :  { %1726 = vrot.lane.b32.xlu0 %v1625_v46, %s2775_s6 }
 0x470   :  { %v1645_v34 = vpop.permute.xlu1 %1644 }
 0x471   :  { %v1643_v47 = vpop.permute.xlu0 %1642  ;;  %v1747_v39 = vsel %vm1301_vm12, %v3646_v1, %v1645_v34 }
 0x472   :  { %v1746_v21 = vsel %vm1301_vm12, %v1594_v54, %v1643_v47 }
 0x474   :  { %v1701_v45 = vpop.permute.xlu1 %1700 }
 0x475   :  { %v1699_v15 = vpop.permute.xlu0 %1698  ;;  %v1764_v37 = vsel %vm1762_vm14, %v1747_v39, %v1701_v45 }
 0x476   :  { %v1763_v10 = vsel %vm1762_vm14, %v1746_v21, %v1699_v15 }
 0x477   :  { %2678 = vmatprep.mubr.msk.f32.mxu1 %vm1792_vm15, %v1763_v10 }
 0x478   :  { %v1649_v38 = vpop.permute.xlu1 %1648  ;;  %2679 = vmatmul.mubr.msk.f32.vlgmr.msra.gmra.mrb[16].mxu1 %vm1792_vm15, %v1764_v37 }
 0x479   :  { %v1647_v29 = vpop.permute.xlu0 %1646  ;;  %v1749_v1 = vsel %vm1301_vm12, %v3664_v6, %v1649_v38 }
 0x47a   :  { %v1748_v13 = vsel %vm1301_vm12, %v1595_v57, %v1647_v29  ;;  %v2776_v57 = vmov 0.0|0.0  }
 0x47b   :  { %2749 = vmatprep.subr.bf16.mxu0 %v2776_v57  ;;  %2755 = vmatprep.subr.bf16.mxu1 %v2776_v57 }
 0x47c   :  { %v1705_v43 = vpop.permute.xlu1 %1704 }
 0x47d   :  { %v1703_v50 = vpop.permute.xlu0 %1702  ;;  %v1766_v11 = vsel %vm1762_vm14, %v1749_v1, %v1705_v43  ;;  %v2111_v43 = vld [vmem:[%s3969_s9 + $0x10] sm:$0xff]  ;;  %v2778_v1 = vmov 0.0  }
 0x47e   :  { %v1765_v26 = vsel %vm1762_vm14, %v1748_v13, %v1703_v50  ;;  %v2112_v13 = vld [vmem:[%s3969_s9 + $0x18] sm:$0xff]  ;;  %2710 = vmatprep.mubr.msk.f32.mxu0 %vm2777_vm0, %v2778_v1 }
 0x47f   :  { %2681 = vmatprep.mubr.msk.f32.mxu1 %vm1792_vm15, %v1765_v26  ;;  %v2753_v50 = vpack.c.bf16 %v2112_v13, %v2111_v43  ;;  %v2215_v26 = vld [vmem:[%s3970_s11] sm:$0xff] }
 0x480   :  { %v1653_v55 = vpop.permute.xlu1 %1652  ;;  %2682 = vmatmul.mubr.msk.f32.gmra.mrb[18].mxu1 %vm1792_vm15, %v1766_v11  ;;  %v2216_v11 = vld [vmem:[%s3970_s11 + $0x8] sm:$0xff] }
 0x481   :  { %v1651_v22 = vpop.permute.xlu0 %1650  ;;  %v1751_v6 = vsel %vm1301_vm12, %v3682_v5, %v1653_v55  ;;  %v2756_v55 = vpack.c.bf16 %v2216_v11, %v2215_v26 }
 0x482   :  { %v1750_v2 = vsel %vm1301_vm12, %v1596_v30, %v1651_v22  ;;  %v2002_v22 = vlaneseq }
 0x483   :  { %2757 = vmatpush3.bf16.msra.mxu1 %v2756_v55 }
 0x484   :  { %v1709_v48 = vpop.permute.xlu1 %1708  ;;  %v2003_v30 = vshrl.u32 %v2002_v22, 7 }
 0x485   :  { %v1707_v28 = vpop.permute.xlu0 %1706  ;;  %v1768_v61 = vsel %vm1762_vm14, %v1751_v6, %v1709_v48  ;;  %v3881_v6 = vld [vmem:[%s3971_s8] ss:$0 sm:$0xff] }
 0x486   :  { %v1767_v36 = vsel %vm1762_vm14, %v1750_v2, %v1707_v28  ;;  %v2004_v48 = vadd.s32 8, %v2003_v30  ;;  %v2005_v28 = vand.u32 1, %v2003_v30 }
 0x487   :  { %2684 = vmatprep.mubr.msk.f32.mxu1 %vm1792_vm15, %v1767_v36 }
 0x488   :  { %v1657_v44 = vpop.permute.xlu1 %1656  ;;  %2685 = vmatmul.mubr.msk.f32.gmra.mrb[20].mxu1 %vm1792_vm15, %v1768_v61  ;;  %v2006_v2 = vand.u32 1, %v2004_v48  ;;  %vm2007_vm2 = vcmp.eq.s32.totalorder %v2005_v28, 0 }
 0x489   :  { %v1655_v17 = vpop.permute.xlu0 %1654  ;;  %v1753_v5 = vsel %vm1301_vm12, %v3700_v42, %v1657_v44 }
 0x48a   :  { %v1752_v33 = vsel %vm1301_vm12, %v1597_v9, %v1655_v17  ;;  %vm2008_vm1 = vcmp.eq.s32.totalorder %v2006_v2, 0 }
 0x48b   :  { %v3885_v17 = vsel %vm2008_vm1, 1.0, %v2778_v1 }
 0x48c   :  { %v1713_v18 = vpop.permute.xlu1 %1712 }
 0x48d   :  { %v1711_v59 = vpop.permute.xlu0 %1710  ;;  %v1770_v40 = vsel %vm1762_vm14, %v1753_v5, %v1713_v18 }
 0x48e   :  { %v1769_v8 = vsel %vm1762_vm14, %v1752_v33, %v1711_v59  ;;  %v3889_v33 = vsel %vm2007_vm2, 1.0, %v2778_v1 }
 0x48f   :  { %2687 = vmatprep.mubr.msk.f32.mxu1 %vm1792_vm15, %v1769_v8 }
 0x490   :  { %v1661_v60 = vpop.permute.xlu1 %1660  ;;  %2688 = vmatmul.mubr.msk.f32.gmra.mrb[22].mxu1 %vm1792_vm15, %v1770_v40 }
 0x491   :  { %v1659_v35 = vpop.permute.xlu0 %1658  ;;  %v1755_v42 = vsel %vm1301_vm12, %v3718_v7, %v1661_v60 }
 0x492   :  { %v1754_v41 = vsel %vm1301_vm12, %v1598_v56, %v1659_v35 }
 0x494   :  { %v1717_v14 = vpop.permute.xlu1 %1716 }
 0x495   :  { %v1715_v63 = vpop.permute.xlu0 %1714  ;;  %v1772_v58 = vsel %vm1762_vm14, %v1755_v42, %v1717_v14 }
 0x496   :  { %v1771_v23 = vsel %vm1762_vm14, %v1754_v41, %v1715_v63 }
 0x497   :  { %2690 = vmatprep.mubr.msk.f32.mxu1 %vm1792_vm15, %v1771_v23 }
 0x498   :  { %v1665_v52 = vpop.permute.xlu1 %1664  ;;  %2691 = vmatmul.mubr.msk.f32.gmra.mrb[24].mxu1 %vm1792_vm15, %v1772_v58 }
 0x499   :  { %v1663_v24 = vpop.permute.xlu0 %1662  ;;  %v1757_v7 = vsel %vm1301_vm12, %v3736_v31, %v1665_v52 }
 0x49a   :  { %v1756_v0 = vsel %vm1301_vm12, %v1599_v16, %v1663_v24 }
 0x49c   :  { %v1721_v49 = vpop.permute.xlu1 %1720 }
 0x49d   :  { %v1719_v62 = vpop.permute.xlu0 %1718  ;;  %v1774_v27 = vsel %vm1762_vm14, %v1757_v7, %v1721_v49 }
 0x49e   :  { %v1773_v20 = vsel %vm1762_vm14, %v1756_v0, %v1719_v62 }
 0x49f   :  { %2693 = vmatprep.mubr.msk.f32.mxu1 %vm1792_vm15, %v1773_v20 }
 0x4a0   :  { %v1669_v46 = vpop.permute.xlu1 %1668  ;;  %2694 = vmatmul.mubr.msk.f32.gmra.mrb[26].mxu1 %vm1792_vm15, %v1774_v27 }
 0x4a1   :  { %v1667_v34 = vpop.permute.xlu0 %1666  ;;  %v1759_v31 = vsel %vm1301_vm12, %v3754_v51, %v1669_v46 }
 0x4a2   :  { %v1758_v47 = vsel %vm1301_vm12, %v1600_v53, %v1667_v34 }
 0x4a4   :  { %v1725_v4 = vpop.permute.xlu1 %1724 }
 0x4a5   :  { %v1723_v54 = vpop.permute.xlu0 %1722  ;;  %v1776_v21 = vsel %vm1762_vm14, %v1759_v31, %v1725_v4 }
 0x4a6   :  { %v1775_v45 = vsel %vm1762_vm14, %v1758_v47, %v1723_v54 }
 0x4a7   :  { %2696 = vmatprep.mubr.msk.f32.mxu1 %vm1792_vm15, %v1775_v45 }
 0x4a8   :  { %v1673_v15 = vpop.permute.xlu1 %1672  ;;  %2697 = vmatmul.mubr.msk.f32.gmra.mrb[28].mxu1 %vm1792_vm15, %v1776_v21 }
 0x4a9   :  { %v1671_v39 = vpop.permute.xlu0 %1670  ;;  %v1761_v51 = vsel %vm1301_vm12, %v3772_v32, %v1673_v15  ;;  %v2750_v32 = vpack.c.bf16 %v2110_v25, %v2109_v12 }
 0x4aa   :  { %v1760_v10 = vsel %vm1301_vm12, %v1601_v19, %v1671_v39 }
 0x4ab   :  { %2751 = vmatpush3.bf16.msra.mxu0 %v2750_v32 }
 0x4ac   :  { %v1729_v3 = vpop.permute.xlu1 %1728  ;;  %2752 = vmatprep.subr.bf16.mxu0 %v2776_v57 }
 0x4ad   :  { %v1727_v37 = vpop.permute.xlu0 %1726  ;;  %v1778_v29 = vsel %vm1762_vm14, %v1761_v51, %v1729_v3 }
 0x4ae   :  { %v1777_v38 = vsel %vm1762_vm14, %v1760_v10, %v1727_v37 }
 0x4af   :  { %2699 = vmatprep.mubr.msk.f32.mxu1 %vm1792_vm15, %v1777_v38  ;;  %2754 = vmatpush3.bf16.msra.mxu0 %v2753_v50 }
 0x4b0   :  { %2700 = vmatmul.mubr.msk.f32.gmra.mrb[30].mxu1 %vm1792_vm15, %v1778_v29  ;;  %2758 = vmatprep.subr.bf16.mxu0 %v2776_v57 }
 0x4b1   :  { %2717 = vmatprep.mubr.msk.f32.mxu1 %vm2777_vm0, %v2778_v1 }
 0x54b   :  { %v2680_v36 = vpop.f32.mrb[16].mxu1 }
 0x54c   :  { %v1913_v61 = vadd.f32 %v2680_v36, %v3881_v6  ;;  %v1907_v44 = vpop.f32.mrb[17].mxu1 }
 0x54d   :  { %v1908_v9 = vadd.f32 %v3881_v6, %v1907_v44 }
 0x54e   :  { %v1987_v18 = vmax.f32 %v1913_v61, 0.0 }
 0x54f   :  { %v1986_v59 = vmax.f32 %v1908_v9, 0.0 }
 0x550   :  { %v2014_v5 = vmul.f32 %v3885_v17, %v1987_v18 }
 0x551   :  { %v2013_v8 = vmul.f32 %v3889_v33, %v1986_v59 }
 0x552   :  { %v2030_v40 = vsel %vm1762_vm14, %v2014_v5, 0.0 }
 0x553   :  { %v2029_v60 = vsel %vm1762_vm14, %v2013_v8, 0.0  ;;  %v2683_v35 = vpop.f32.mrb[18].mxu1 }
 0x554   :  { %v2031_v56 = vadd.f32 %v2030_v40, %v2029_v60  ;;  %v1923_v14 = vadd.f32 %v2683_v35, %v3881_v6  ;;  %v1917_v41 = vpop.f32.mrb[19].mxu1 }
 0x555   :  { %v1918_v63 = vadd.f32 %v3881_v6, %v1917_v41 }
 0x556   :  { %v2032_v42 = vrot.slane %v2031_v56, 4  ;;  %v1989_v23 = vmax.f32 %v1923_v14, 0.0 }
 0x557   :  { %v1988_v58 = vmax.f32 %v1918_v63, 0.0 }
 0x558   :  { %v2033_v52 = vadd.f32 %v2032_v42, %v2031_v56  ;;  %v2016_v24 = vmul.f32 %v3885_v17, %v1989_v23 }
 0x559   :  { %v2015_v16 = vmul.f32 %v3889_v33, %v1988_v58 }
 0x55a   :  { %v2034_v49 = vrot.slane %v2033_v52, 2  ;;  %v2039_v0 = vsel %vm1762_vm14, %v2016_v24, 0.0 }
 0x55b   :  { %v2038_v62 = vsel %vm1762_vm14, %v2015_v16, 0.0  ;;  %v2686_v7 = vpop.f32.mrb[20].mxu1 }
 0x55c   :  { %v2040_v20 = vadd.f32 %v2039_v0, %v2038_v62  ;;  %v1933_v27 = vadd.f32 %v2686_v7, %v3881_v6  ;;  %v1927_v46 = vpop.f32.mrb[21].mxu1  ;;  %v2035_v53 = vadd.f32 %v2034_v49, %v2033_v52 }
 0x55d   :  { %v1928_v34 = vadd.f32 %v3881_v6, %v1927_v46 }
 0x55e   :  { %v2041_v4 = vrot.slane %v2040_v20, 4  ;;  %v1991_v47 = vmax.f32 %v1933_v27, 0.0  ;;  %v2036_v15 = vrot.slane %v2035_v53, 1 }
 0x55f   :  { %v1990_v54 = vmax.f32 %v1928_v34, 0.0 }
 0x560   :  { %v2042_v31 = vadd.f32 %v2041_v4, %v2040_v20  ;;  %v2018_v45 = vmul.f32 %v3885_v17, %v1991_v47  ;;  %v2037_v12 = vadd.f32 %v2036_v15, %v2035_v53 }
 0x561   :  { %v2017_v21 = vmul.f32 %v3889_v33, %v1990_v54 }
 0x562   :  { %v2043_v39 = vrot.slane %v2042_v31, 2  ;;  %v2048_v19 = vsel %vm1762_vm14, %v2018_v45, 0.0  ;;  %v2101_v22 = vmul.f32 0.125, %v2037_v12 }
 0x563   :  { %v2047_v3 = vsel %vm1762_vm14, %v2017_v21, 0.0  ;;  %v2689_v10 = vpop.f32.mrb[22].mxu1 }
 0x564   :  { %v2044_v37 = vadd.f32 %v2043_v39, %v2042_v31  ;;  %v2049_v51 = vadd.f32 %v2048_v19, %v2047_v3  ;;  %v1943_v38 = vadd.f32 %v2689_v10, %v3881_v6  ;;  %v1937_v29 = vpop.f32.mrb[23].mxu1 }
 0x565   :  { %v1938_v57 = vadd.f32 %v3881_v6, %v1937_v29 }
 0x566   :  { %v2045_v25 = vrot.slane %v2044_v37, 1  ;;  %v2050_v32 = vrot.slane %v2049_v51, 4  ;;  %v1993_v43 = vmax.f32 %v1943_v38, 0.0 }
 0x567   :  { %v1992_v13 = vmax.f32 %v1938_v57, 0.0 }
 0x568   :  { %v2046_v50 = vadd.f32 %v2045_v25, %v2044_v37  ;;  %v2051_v26 = vadd.f32 %v2050_v32, %v2049_v51  ;;  %v2020_v11 = vmul.f32 %v3885_v17, %v1993_v43 }
 0x569   :  { %v2019_v55 = vmul.f32 %v3889_v33, %v1992_v13 }
 0x56a   :  { %v2102_v30 = vmul.f32 0.125, %v2046_v50  ;;  %v2052_v48 = vrot.slane %v2051_v26, 2  ;;  %v2057_v2 = vsel %vm1762_vm14, %v2020_v11, 0.0 }
 0x56b   :  { %v2056_v28 = vsel %vm1762_vm14, %v2019_v55, 0.0  ;;  %v2692_v36 = vpop.f32.mrb[24].mxu1 }
 0x56c   :  { %v2129_v61 = vsel %vm2128_vm3, %v2102_v30, %v2101_v22  ;;  %v2053_v44 = vadd.f32 %v2052_v48, %v2051_v26  ;;  %v2058_v9 = vadd.f32 %v2057_v2, %v2056_v28  ;;  %v1953_v18 = vadd.f32 %v2692_v36, %v3881_v6  ;;  %v1947_v59 = vpop.f32.mrb[25].mxu1 }
 0x56d   :  { %v1948_v5 = vadd.f32 %v3881_v6, %v1947_v59 }
 0x56e   :  { %v2054_v8 = vrot.slane %v2053_v44, 1  ;;  %v2059_v40 = vrot.slane %v2058_v9, 4  ;;  %v1995_v60 = vmax.f32 %v1953_v18, 0.0 }
 0x56f   :  { %v1994_v35 = vmax.f32 %v1948_v5, 0.0 }
 0x570   :  { %v2055_v56 = vadd.f32 %v2054_v8, %v2053_v44  ;;  %v2060_v14 = vadd.f32 %v2059_v40, %v2058_v9  ;;  %v2022_v41 = vmul.f32 %v3885_v17, %v1995_v60 }
 0x571   :  { %v2021_v63 = vmul.f32 %v3889_v33, %v1994_v35 }
 0x572   :  { %v2103_v42 = vmul.f32 0.125, %v2055_v56  ;;  %v2061_v23 = vrot.slane %v2060_v14, 2  ;;  %v2066_v58 = vsel %vm1762_vm14, %v2022_v41, 0.0 }
 0x573   :  { %v2065_v52 = vsel %vm1762_vm14, %v2021_v63, 0.0  ;;  %v2695_v24 = vpop.f32.mrb[26].mxu1 }
 0x574   :  { %v2131_v16 = vsel %vm2130_vm4, %v2103_v42, %v2129_v61  ;;  %v2062_v49 = vadd.f32 %v2061_v23, %v2060_v14  ;;  %v2067_v0 = vadd.f32 %v2066_v58, %v2065_v52  ;;  %v1963_v62 = vadd.f32 %v2695_v24, %v3881_v6  ;;  %v1957_v7 = vpop.f32.mrb[27].mxu1 }
 0x575   :  { %v1958_v20 = vadd.f32 %v3881_v6, %v1957_v7 }
 0x576   :  { %v2063_v27 = vrot.slane %v2062_v49, 1  ;;  %v2068_v46 = vrot.slane %v2067_v0, 4  ;;  %v1997_v34 = vmax.f32 %v1963_v62, 0.0 }
 0x577   :  { %v1996_v53 = vmax.f32 %v1958_v20, 0.0 }
 0x578   :  { %v2064_v4 = vadd.f32 %v2063_v27, %v2062_v49  ;;  %v2069_v47 = vadd.f32 %v2068_v46, %v2067_v0  ;;  %v2024_v54 = vmul.f32 %v3885_v17, %v1997_v34  ;;  %v2489_v34 = vld [vmem:[%s3972_s10] ss:$0 sm:$0xff] }
 0x579   :  { %v2023_v31 = vmul.f32 %v3889_v33, %v1996_v53 }
 0x57a   :  { %v2104_v45 = vmul.f32 0.125, %v2064_v4  ;;  %v2070_v21 = vrot.slane %v2069_v47, 2  ;;  %v2075_v15 = vsel %vm1762_vm14, %v2024_v54, 0.0 }
 0x57b   :  { %v2074_v39 = vsel %vm1762_vm14, %v2023_v31, 0.0  ;;  %v2698_v19 = vpop.f32.mrb[28].mxu1  ;;  %v2298_v31 = vld [vmem:[%s3973_s13] sm:$0xff] }
 0x57c   :  { %v2133_v3 = vsel %vm2132_vm5, %v2104_v45, %v2131_v16  ;;  %v2071_v10 = vadd.f32 %v2070_v21, %v2069_v47  ;;  %v2076_v37 = vadd.f32 %v2075_v15, %v2074_v39  ;;  %v1973_v51 = vadd.f32 %v2698_v19, %v3881_v6  ;;  %v1967_v38 = vpop.f32.mrb[29].mxu1  ;;  %v2299_v45 = vld [vmem:[%s3973_s13 + $0x8] sm:$0xff] }
 0x57d   :  { %v1968_v29 = vadd.f32 %v3881_v6, %v1967_v38  ;;  %v2759_v21 = vpack.c.bf16 %v2299_v45, %v2298_v31 }
 0x57e   :  { %v2072_v57 = vrot.slane %v2071_v10, 1  ;;  %v2077_v12 = vrot.slane %v2076_v37, 4  ;;  %v1999_v25 = vmax.f32 %v1973_v51, 0.0 }
 0x57f   :  { %v1998_v32 = vmax.f32 %v1968_v29, 0.0 }
 0x580   :  { %v2073_v43 = vadd.f32 %v2072_v57, %v2071_v10  ;;  %v2078_v13 = vadd.f32 %v2077_v12, %v2076_v37  ;;  %v2026_v50 = vmul.f32 %v3885_v17, %v1999_v25  ;;  %v2493_v10 = vld [vmem:[%s3975_s14] ss:$0 sm:$0xff] }
 0x581   :  { %v2025_v26 = vmul.f32 %v3889_v33, %v1998_v32 }
 0x582   :  { %v2105_v11 = vmul.f32 0.125, %v2073_v43  ;;  %v2079_v55 = vrot.slane %v2078_v13, 2  ;;  %v2084_v22 = vsel %vm1762_vm14, %v2026_v50, 0.0 }
 0x583   :  { %v2083_v30 = vsel %vm1762_vm14, %v2025_v26, 0.0  ;;  %v2701_v48 = vpop.f32.mrb[30].mxu1 }
 0x584   :  { %v2080_v2 = vadd.f32 %v2079_v55, %v2078_v13  ;;  %v2085_v28 = vadd.f32 %v2084_v22, %v2083_v30  ;;  %v1983_v36 = vadd.f32 %v2701_v48, %v3881_v6  ;;  %v1977_v61 = vpop.f32.mrb[31].mxu1  ;;  %v2135_v44 = vsel %vm2134_vm6, %v2105_v11, %v2133_v3 }
 0x585   :  { %v1978_v9 = vadd.f32 %v3881_v6, %v1977_v61 }
 0x586   :  { %v2081_v18 = vrot.slane %v2080_v2, 1  ;;  %v2086_v59 = vrot.slane %v2085_v28, 4  ;;  %v2001_v5 = vmax.f32 %v1983_v36, 0.0 }
 0x587   :  { %v2000_v8 = vmax.f32 %v1978_v9, 0.0 }
 0x588   :  { %v2082_v40 = vadd.f32 %v2081_v18, %v2080_v2  ;;  %v2087_v60 = vadd.f32 %v2086_v59, %v2085_v28  ;;  %v2028_v35 = vmul.f32 %v3885_v17, %v2001_v5 }
 0x589   :  { %v2027_v56 = vmul.f32 %v3889_v33, %v2000_v8 }
 0x58a   :  { %v2106_v14 = vmul.f32 0.125, %v2082_v40  ;;  %v2088_v41 = vrot.slane %v2087_v60, 2  ;;  %v2093_v63 = vsel %vm1762_vm14, %v2028_v35, 0.0 }
 0x58b   :  { %v2092_v42 = vsel %vm1762_vm14, %v2027_v56, 0.0 }
 0x58c   :  { %v2089_v23 = vadd.f32 %v2088_v41, %v2087_v60  ;;  %v2094_v58 = vadd.f32 %v2093_v63, %v2092_v42  ;;  %v2137_v6 = vsel %vm2136_vm7, %v2106_v14, %v2135_v44 }
 0x58e   :  { %v2090_v52 = vrot.slane %v2089_v23, 1  ;;  %v2095_v24 = vrot.slane %v2094_v58, 4 }
 0x590   :  { %v2091_v16 = vadd.f32 %v2090_v52, %v2089_v23  ;;  %v2096_v49 = vadd.f32 %v2095_v24, %v2094_v58 }
 0x592   :  { %v2107_v0 = vmul.f32 0.125, %v2091_v16  ;;  %v2097_v62 = vrot.slane %v2096_v49, 2 }
 0x594   :  { %v2098_v17 = vadd.f32 %v2097_v62, %v2096_v49  ;;  %v2139_v7 = vsel %vm2138_vm8, %v2107_v0, %v2137_v6 }
 0x596   :  { %v2099_v33 = vrot.slane %v2098_v17, 1 }
 0x598   :  { %v2100_v20 = vadd.f32 %v2099_v33, %v2098_v17 }
 0x59a   :  { %v2108_v27 = vmul.f32 0.125, %v2100_v20 }
 0x59c   :  { %v2141_v46 = vsel %vm2140_vm10, %v2108_v27, %v2139_v7 }
 0x59d   :  { %2711 = vmatmul.mubr.msk.f32.vlgmr.msra.gmra.mrb[32].mxu0 %vm1762_vm14, %v2141_v46 }
 0x59e   :  { %2724 = vmatprep.mubr.msk.f32.mxu0 %vm2777_vm0, %v2778_v1  ;;  %2760 = vmatpush3.bf16.msra.mxu0 %v2759_v21  ;;  %v2491_v1 = vld [vmem:[%s3974_s12] ss:$0 sm:$0xff] }
 0x670   :  { %v2210_v53 = vpop.f32.mrb[32].mxu0 }
 0x671   :  { %v2211_v4 = vadd.f32 %v2489_v34, %v2210_v53  ;;  %v2712_v47 = vpop.f32.mrb[33].mxu0 }
 0x673   :  { %v2214_v54 = vmax.f32 %v2211_v4, 0.0 }
 0x675   :  { %2718 = vmatmul.mubr.msk.f32.vlgmr.msra.gmra.mrb[32].mxu1 %vm1301_vm12, %v2214_v54 }
 0x748   :  { %v2293_v15 = vpop.f32.mrb[32].mxu1 }
 0x749   :  { %v2294_v39 = vadd.f32 %v2491_v1, %v2293_v15  ;;  %v2719_v19 = vpop.f32.mrb[33].mxu1 }
 0x74b   :  { %v2297_v3 = vmax.f32 %v2294_v39, 0.0 }
 0x74d   :  { %2725 = vmatmul.mubr.msk.f32.vlgmr.msra.gmra.mrb[34].mxu0 %vm1301_vm12, %v2297_v3 }
 0x820   :  { %v2376_v37 = vpop.f32.mrb[34].mxu0 }
 0x821   :  { %v2377_v51 = vadd.f32 %v2493_v10, %v2376_v37  ;;  %v2726_v38 = vpop.f32.mrb[35].mxu0 }
 0x823   :  { %2380 = vxpose.xlu0.b32.start.end [1/1] (short) (narrow) %v2377_v51, 8 }
 0x8a3   :  { %v2396_v29 = vpop.trf.xlu0 }
 0x8a4   :  { %2412 = vst.msk [vmem:[%s3976_s15] sm:$0xff] %vm756_vm9, %v2396_v29 }

</bundles_post_ra>
